<compile_context>
chip_gen: v5e
topology: v5e:2x2
jax: 0.10.0
libtpu: 0.0.40
codegen_flags: <defaults>
</compile_context>

<pallas_src>
import jax
import jax.numpy as jnp
import numpy as np
from jax import lax
from jax.experimental import pallas as pl
from jax.experimental.pallas import tpu as pltpu

EPS = 1e-5
KH = 3  # conv kernel height / width


def _round_up(a, b):
    return (a + b - 1) // b * b


def _make_kernel(N, H, W, CWp):
    Ho, H2 = H - 2, H - 4
    cnt1 = float(N * Ho * W)
    cnt2 = float(N * H2 * W)
    f32, bf16 = jnp.float32, jnp.bfloat16

    def kernel(x_ref, r_ref, wc_ref, wf_ref, pc_ref, mk_ref, o_ref):
        # x_ref : (CWp, L)       f32   rows=(channel,width) zero-padded, lanes=(batch,height)
        # r_ref : (2, L, L)      bf16  banded 0/1 height-shift matrices (shift 1, 2)
        # wc_ref: (6*CWp, CWp)   bf16  conv Toeplitz mats [conv1 kh0..2 ; conv2 kh0..2]
        # wf_ref: (CWp+8, CWp)   f32   [gg channel-group ones ; fc head]
        # pc_ref: (CWp, 8)       f32   per-row g1, b1, g2, b2, fc bias
        # mk_ref: (2, L)         f32   valid-lane masks (h<Ho, h<H2)
        # o_ref : (8, L)         f32   rows 0..C-1 / lanes h<H2 valid
        x = x_ref[...]
        r1 = r_ref[0]
        r2 = r_ref[1]
        gg = wf_ref[0:CWp, :]                 # (CWp, CWp) group-sum/broadcast
        fmat = wf_ref[CWp:CWp + 8, :]         # (8, CWp)   Linear(3,1) head

        g1 = pc_ref[:, 0:1]
        b1 = pc_ref[:, 1:2]
        g2 = pc_ref[:, 2:3]
        b2 = pc_ref[:, 3:4]
        bfc = pc_ref[0:1, 4:5]
        mask1 = mk_ref[0:1, :]
        mask2 = mk_ref[1:2, :]

        def conv(zb, base):
            # Height shifts as 0/1 matmuls (exact selection of bf16 values);
            # three Toeplitz matmuls implement the full 3x3 conv.
            s1 = jnp.dot(zb, r1, preferred_element_type=f32)
            s2 = jnp.dot(zb, r2, preferred_element_type=f32)
            y = jnp.dot(wc_ref[base:base + CWp, :], zb,
                        preferred_element_type=f32)
            y = y + jnp.dot(wc_ref[base + CWp:base + 2 * CWp, :],
                            s1.astype(bf16), preferred_element_type=f32)
            y = y + jnp.dot(wc_ref[base + 2 * CWp:base + 3 * CWp, :],
                            s2.astype(bf16), preferred_element_type=f32)
            return y, s2

        def batch_norm(y, mask, gamma, beta, cnt):
            # Training-mode stats; lane-sum [y, y^2] (masked to valid lanes),
            # then one small matmul both sums within a channel group and
            # broadcasts back to its rows.  var = E[x^2] - mean^2.
            ym = y * mask
            s = jnp.concatenate(
                [jnp.sum(ym, axis=1, keepdims=True),
                 jnp.sum(ym * y, axis=1, keepdims=True)], axis=1)    # (CWp, 2)
            gs = jnp.dot(gg, s, preferred_element_type=f32) * (1.0 / cnt)
            mean = gs[:, 0:1]
            var = gs[:, 1:2] - mean * mean
            scale = gamma * lax.rsqrt(var + EPS)
            return y * scale + (beta - mean * scale)

        # conv1 -> BN -> ReLU
        xb = x.astype(bf16)
        y1, x_sh2 = conv(xb, 0)
        y1 = jnp.maximum(batch_norm(y1, mask1, g1, b1, cnt1), 0.0)

        # conv2 -> BN
        y2, _ = conv(y1.astype(bf16), 3 * CWp)
        y2 = batch_norm(y2, mask2, g2, b2, cnt2)

        # identity shortcut (x shifted by 2 along H == center crop) + ReLU
        r = jnp.maximum(y2 + x_sh2, 0.0)

        # Linear(3,1) head; single dense (8, L) store.
        o_ref[...] = jnp.dot(fmat, r, preferred_element_type=f32) + bfc

    return kernel


def build_resblock_forward(params, N, C, H, W):
    """Packs parameters once (host-side numpy) and returns a jitted forward."""
    w1, w2, g1, b1, g2, b2, wfc, bfc = (np.asarray(p, np.float32) for p in params)
    assert wfc.shape == (1, W), "Linear(3,1) head acts on the width axis"
    CW = C * W
    CWp = _round_up(max(CW, 8), 8)
    L, Ho, H2 = N * H, H - 2, H - 4
    assert H2 > 0
    assert L % 128 == 0, "pick N*H as a multiple of 128 (ideally 256)"

    # ---- conv weights as per-kh Toeplitz matrices over the (channel, width)
    # rows; the width conv (stride 1, zero pad 1) is folded in.
    def conv_mats(w):
        m = np.zeros((KH, CWp, CWp), np.float32)
        for kh in range(KH):
            for co in range(C):
                for wo in range(W):
                    for ci in range(C):
                        for wi in range(W):
                            kw = wi - wo + 1
                            if 0 <= kw < KH:
                                m[kh, co * W + wo, ci * W + wi] = w[co, ci, kh, kw]
        return m

    wc = np.concatenate([conv_mats(w1), conv_mats(w2)], 0).reshape(6 * CWp, CWp)
    wc = jnp.asarray(wc, jnp.bfloat16)                     # bf16 MXU operands

    gg = np.zeros((CWp, CWp), np.float32)
    fmat = np.zeros((8, CWp), np.float32)
    for c in range(C):
        gg[c * W:(c + 1) * W, c * W:(c + 1) * W] = 1.0
        fmat[c, c * W:(c + 1) * W] = wfc[0]
    wf = jnp.asarray(np.concatenate([gg, fmat], axis=0))   # (CWp+8, CWp) f32

    pc = np.zeros((CWp, 8), np.float32)
    pc[:CW, 0] = np.repeat(g1, W)
    pc[:CW, 1] = np.repeat(b1, W)
    pc[:CW, 2] = np.repeat(g2, W)
    pc[:CW, 3] = np.repeat(b2, W)
    pc[:, 4] = bfc[0]
    pc = jnp.asarray(pc)

    # ---- banded 0/1 height-shift matrices (block-diagonal over batch) and
    # valid-lane masks, built once.
    idx = np.arange(L)
    blk, h = idx // H, idx % H
    same = blk[:, None] == blk[None, :]
    dh = h[:, None] - h[None, :]
    rmat = np.stack([(same & (dh == k)).astype(np.float32) for k in (1, 2)])
    rmat = jnp.asarray(rmat, jnp.bfloat16)                 # (2, L, L), exact 0/1
    mk = jnp.asarray(np.stack([(h < Ho), (h < H2)]).astype(np.float32))  # (2, L)

    kernel = _make_kernel(N, H, W, CWp)

    flops = int(2 * (4 * CWp * L * L)        # height-shift matmuls
                + 2 * (6 * CWp * CWp * L)    # conv Toeplitz matmuls
                + 2 * (8 * CWp * L)          # fc head
                + 30 * CWp * L)              # BN / ReLU elementwise
    bytes_accessed = int(4 * CWp * L + 2 * 2 * L * L + 2 * 6 * CWp * CWp
                         + 4 * (CWp + 8) * CWp + 4 * CWp * 8 + 4 * 2 * L
                         + 4 * 8 * L)
    cost = pl.CostEstimate(flops=flops, transcendentals=2 * CWp,
                           bytes_accessed=bytes_accessed)

    vmem = pl.BlockSpec(memory_space=pltpu.MemorySpace.VMEM)
    call = pl.pallas_call(
        kernel,
        out_shape=jax.ShapeDtypeStruct((8, L), jnp.float32),
        in_specs=[vmem] * 6,
        out_specs=vmem,
        cost_estimate=cost,
        # NOTE: a single block fits VMEM comfortably at this size.  When N/H
        # scale up, add a batch grid with dimension_semantics=("parallel",)
        # (two-pass BN stats) so both v7x TensorCores are used, and re-derive
        # the block size for v7x's 64 MiB VMEM via
        # pltpu.CompilerParams(vmem_limit_bytes=...).
    )

    @jax.jit
    def forward(x):
        # TODO(synk): at deployment sizes the producer should emit the
        # (channel*width, batch*height) layout directly; this transpose is an
        # extra HBM pass that only matters once N*H is large.
        xr = jnp.transpose(x, (1, 3, 0, 2)).reshape(CW, L)
        xr = jnp.pad(xr, ((0, CWp - CW), (0, 0)))
        out = call(xr, rmat, wc, wf, pc, mk)
        y = out[:C].reshape(C, N, H)[:, :, :H2]
        return jnp.transpose(y, (1, 0, 2))[:, :, :, None]

    return forward


def reference(x, params):
    """Pure-JAX reference with identical semantics (for verification)."""
    w1, w2, g1, b1, g2, b2, wfc, bfc = params

    def conv(x, w):
        return lax.conv_general_dilated(
            x, w, window_strides=(1, 1), padding=((0, 0), (1, 1)),
            dimension_numbers=("NCHW", "OIHW", "NCHW"),
            precision=lax.Precision.HIGHEST)

    def bn_train(x, g, b):
        mean = jnp.mean(x, axis=(0, 2, 3), keepdims=True)
        var = jnp.mean((x - mean) ** 2, axis=(0, 2, 3), keepdims=True)
        return ((x - mean) / jnp.sqrt(var + EPS)
                * g.reshape(1, -1, 1, 1) + b.reshape(1, -1, 1, 1))

    y = jax.nn.relu(bn_train(conv(x, w1), g1, b1))
    y = bn_train(conv(y, w2), g2, b2)
    H2 = y.shape[2]
    y = jax.nn.relu(y + x[:, :, 2:2 + H2, :])
    y = jnp.einsum("nchw,ow->ncho", y, wfc,
                   precision=lax.Precision.HIGHEST) + bfc
    return y


if __name__ == "__main__":
    # W must be 3 (Linear(3,1) acts on the last axis); N*H = 256 lanes gives
    # fully dense vregs and an MXU-width RHS while staying small.
    N, C, H, W = 16, 3, 16, 3

    key = jax.random.PRNGKey(0)
    k_x, k_w1, k_w2, k_fc, k_fcb = jax.random.split(key, 5)

    x = jax.random.normal(k_x, (N, C, H, W), jnp.float32)

    w1 = jax.random.normal(k_w1, (C, C, 3, 3), jnp.float32) * 0.2   # Conv2d(3,3,3)
    w2 = jax.random.normal(k_w2, (C, C, 3, 3), jnp.float32) * 0.2   # Conv2d(3,3,3)
    g1 = 1.0 + 0.1 * jnp.arange(C, dtype=jnp.float32)               # BN1 gamma
    b1 = 0.05 * jnp.arange(C, dtype=jnp.float32)                    # BN1 beta
    g2 = 1.0 - 0.1 * jnp.arange(C, dtype=jnp.float32)               # BN2 gamma
    b2 = -0.05 * jnp.arange(C, dtype=jnp.float32)                   # BN2 beta
    wfc = jax.random.normal(k_fc, (1, W), jnp.float32) * 0.3        # Linear weight
    bfc = jax.random.normal(k_fcb, (1,), jnp.float32) * 0.1         # Linear bias

    params = (w1, w2, g1, b1, g2, b2, wfc, bfc)

    forward = build_resblock_forward(params, N, C, H, W)
    out = forward(x)
    jax.block_until_ready(out)

    ref = reference(x, params)
    assert out.shape == (N, C, H - 4, 1), out.shape
    err = float(jnp.max(jnp.abs(out - ref)))
    # bf16 MXU operands (per review) + the E[x^2]-mean^2 variance rewrite ->
    # looser tolerance than the all-f32 HIGHEST-precision XLA reference.
    assert jnp.allclose(out, ref, atol=5e-2, rtol=5e-2), f"max abs err = {err}"

    print("KERNEL_OK")
</pallas_src>

<mosaic_0001>
module attributes {stable_mosaic.version = 11 : i64} {
  func.func @kernel(%arg0: memref<16x256xf32, #tpu.memory_space<vmem>>, %arg1: memref<2x256x256xbf16, #tpu.memory_space<vmem>>, %arg2: memref<96x16xbf16, #tpu.memory_space<vmem>>, %arg3: memref<24x16xf32, #tpu.memory_space<vmem>>, %arg4: memref<16x8xf32, #tpu.memory_space<vmem>>, %arg5: memref<2x256xf32, #tpu.memory_space<vmem>>, %arg6: memref<8x256xf32, #tpu.memory_space<vmem>>) attributes {dimension_semantics = [], scalar_prefetch = 0 : i64, scratch_operands = 0 : i64, tpu.core_type = #tpu.core_type<tc>} {
    %c0 = arith.constant 0 : index
    %c0_0 = arith.constant 0 : index
    %0 = vector.load %arg0[%c0, %c0_0] : memref<16x256xf32, #tpu.memory_space<vmem>>, vector<16x256xf32>
    %c0_1 = arith.constant 0 : index
    %c0_2 = arith.constant 0 : index
    %c0_3 = arith.constant 0 : index
    %1 = vector.load %arg1[%c0_1, %c0_2, %c0_3] : memref<2x256x256xbf16, #tpu.memory_space<vmem>>, vector<1x256x256xbf16>
    %2 = vector.shape_cast %1 : vector<1x256x256xbf16> to vector<256x256xbf16>
    %c1 = arith.constant 1 : index
    %c0_4 = arith.constant 0 : index
    %c0_5 = arith.constant 0 : index
    %3 = vector.load %arg1[%c1, %c0_4, %c0_5] : memref<2x256x256xbf16, #tpu.memory_space<vmem>>, vector<1x256x256xbf16>
    %4 = vector.shape_cast %3 : vector<1x256x256xbf16> to vector<256x256xbf16>
    %c0_6 = arith.constant 0 : index
    %c0_7 = arith.constant 0 : index
    %5 = vector.load %arg3[%c0_6, %c0_7] : memref<24x16xf32, #tpu.memory_space<vmem>>, vector<16x16xf32>
    %c16 = arith.constant 16 : index
    %c0_8 = arith.constant 0 : index
    %6 = vector.load %arg3[%c16, %c0_8] : memref<24x16xf32, #tpu.memory_space<vmem>>, vector<8x16xf32>
    %c0_9 = arith.constant 0 : index
    %c0_10 = arith.constant 0 : index
    %7 = vector.load %arg4[%c0_9, %c0_10] : memref<16x8xf32, #tpu.memory_space<vmem>>, vector<16x1xf32>
    %c0_11 = arith.constant 0 : index
    %c1_12 = arith.constant 1 : index
    %8 = vector.load %arg4[%c0_11, %c1_12] : memref<16x8xf32, #tpu.memory_space<vmem>>, vector<16x1xf32>
    %c0_13 = arith.constant 0 : index
    %c2 = arith.constant 2 : index
    %9 = vector.load %arg4[%c0_13, %c2] : memref<16x8xf32, #tpu.memory_space<vmem>>, vector<16x1xf32>
    %c0_14 = arith.constant 0 : index
    %c3 = arith.constant 3 : index
    %10 = vector.load %arg4[%c0_14, %c3] : memref<16x8xf32, #tpu.memory_space<vmem>>, vector<16x1xf32>
    %c0_15 = arith.constant 0 : index
    %c4 = arith.constant 4 : index
    %11 = vector.load %arg4[%c0_15, %c4] : memref<16x8xf32, #tpu.memory_space<vmem>>, vector<1x1xf32>
    %c0_16 = arith.constant 0 : index
    %c0_17 = arith.constant 0 : index
    %12 = vector.load %arg5[%c0_16, %c0_17] : memref<2x256xf32, #tpu.memory_space<vmem>>, vector<1x256xf32>
    %c1_18 = arith.constant 1 : index
    %c0_19 = arith.constant 0 : index
    %13 = vector.load %arg5[%c1_18, %c0_19] : memref<2x256xf32, #tpu.memory_space<vmem>>, vector<1x256xf32>
    %14 = arith.truncf %0 : vector<16x256xf32> to vector<16x256xbf16>
    %cst = arith.constant dense<0.000000e+00> : vector<16x256xf32>
    %15 = tpu.matmul %14, %2, %cst {dimension_numbers = #tpu.dot_dimension_numbers<[1], [0], [0], [1], [0, 0, 1, 1], [], []>} : vector<16x256xbf16>, vector<256x256xbf16>, vector<16x256xf32> -> vector<16x256xf32>
    %cst_20 = arith.constant dense<0.000000e+00> : vector<16x256xf32>
    %16 = tpu.matmul %14, %4, %cst_20 {dimension_numbers = #tpu.dot_dimension_numbers<[1], [0], [0], [1], [0, 0, 1, 1], [], []>} : vector<16x256xbf16>, vector<256x256xbf16>, vector<16x256xf32> -> vector<16x256xf32>
    %c0_21 = arith.constant 0 : index
    %c0_22 = arith.constant 0 : index
    %17 = vector.load %arg2[%c0_21, %c0_22] : memref<96x16xbf16, #tpu.memory_space<vmem>>, vector<16x16xbf16>
    %cst_23 = arith.constant dense<0.000000e+00> : vector<16x256xf32>
    %18 = tpu.matmul %17, %14, %cst_23 {dimension_numbers = #tpu.dot_dimension_numbers<[1], [0], [0], [1], [0, 0, 1, 1], [], []>} : vector<16x16xbf16>, vector<16x256xbf16>, vector<16x256xf32> -> vector<16x256xf32>
    %c16_24 = arith.constant 16 : index
    %c0_25 = arith.constant 0 : index
    %19 = vector.load %arg2[%c16_24, %c0_25] : memref<96x16xbf16, #tpu.memory_space<vmem>>, vector<16x16xbf16>
    %20 = arith.truncf %15 : vector<16x256xf32> to vector<16x256xbf16>
    %cst_26 = arith.constant dense<0.000000e+00> : vector<16x256xf32>
    %21 = tpu.matmul %19, %20, %cst_26 {dimension_numbers = #tpu.dot_dimension_numbers<[1], [0], [0], [1], [0, 0, 1, 1], [], []>} : vector<16x16xbf16>, vector<16x256xbf16>, vector<16x256xf32> -> vector<16x256xf32>
    %22 = arith.addf %18, %21 : vector<16x256xf32>
    %c32 = arith.constant 32 : index
    %c0_27 = arith.constant 0 : index
    %23 = vector.load %arg2[%c32, %c0_27] : memref<96x16xbf16, #tpu.memory_space<vmem>>, vector<16x16xbf16>
    %24 = arith.truncf %16 : vector<16x256xf32> to vector<16x256xbf16>
    %cst_28 = arith.constant dense<0.000000e+00> : vector<16x256xf32>
    %25 = tpu.matmul %23, %24, %cst_28 {dimension_numbers = #tpu.dot_dimension_numbers<[1], [0], [0], [1], [0, 0, 1, 1], [], []>} : vector<16x16xbf16>, vector<16x256xbf16>, vector<16x256xf32> -> vector<16x256xf32>
    %26 = arith.addf %22, %25 : vector<16x256xf32>
    %27 = vector.broadcast %12 : vector<1x256xf32> to vector<16x256xf32>
    %28 = arith.mulf %26, %27 : vector<16x256xf32>
    %cst_29 = arith.constant dense<0.000000e+00> : vector<16xf32>
    %29 = vector.multi_reduction <add>, %28, %cst_29 [1] : vector<16x256xf32> to vector<16xf32>
    %30 = vector.shape_cast %29 : vector<16xf32> to vector<16x1xf32>
    %31 = arith.mulf %28, %26 : vector<16x256xf32>
    %cst_30 = arith.constant dense<0.000000e+00> : vector<16xf32>
    %32 = vector.multi_reduction <add>, %31, %cst_30 [1] : vector<16x256xf32> to vector<16xf32>
    %33 = vector.shape_cast %32 : vector<16xf32> to vector<16x1xf32>
    %34 = tpu.concatenate %30, %33 in 1 : vector<16x1xf32>, vector<16x1xf32> -> vector<16x2xf32>
    %cst_31 = arith.constant dense<0.000000e+00> : vector<16x2xf32>
    %35 = tpu.matmul %5, %34, %cst_31 {dimension_numbers = #tpu.dot_dimension_numbers<[1], [0], [0], [1], [0, 0, 1, 1], [], []>} : vector<16x16xf32>, vector<16x2xf32>, vector<16x2xf32> -> vector<16x2xf32>
    %cst_32 = arith.constant 0.00148809527 : f32
    %36 = vector.broadcast %cst_32 : f32 to vector<16x2xf32>
    %37 = arith.mulf %35, %36 : vector<16x2xf32>
    %38 = vector.extract_strided_slice %37 {offsets = [0, 0], sizes = [16, 1], strides = [1, 1]} : vector<16x2xf32> to vector<16x1xf32>
    %39 = vector.extract_strided_slice %37 {offsets = [0, 1], sizes = [16, 1], strides = [1, 1]} : vector<16x2xf32> to vector<16x1xf32>
    %40 = arith.mulf %38, %38 : vector<16x1xf32>
    %41 = arith.subf %39, %40 : vector<16x1xf32>
    %cst_33 = arith.constant 9.99999974E-6 : f32
    %42 = vector.broadcast %cst_33 : f32 to vector<16x1xf32>
    %43 = arith.addf %41, %42 : vector<16x1xf32>
    %44 = math.rsqrt %43 : vector<16x1xf32>
    %45 = arith.mulf %7, %44 : vector<16x1xf32>
    %46 = vector.broadcast %45 : vector<16x1xf32> to vector<16x256xf32>
    %47 = arith.mulf %26, %46 : vector<16x256xf32>
    %48 = arith.mulf %38, %45 : vector<16x1xf32>
    %49 = arith.subf %8, %48 : vector<16x1xf32>
    %50 = vector.broadcast %49 : vector<16x1xf32> to vector<16x256xf32>
    %51 = arith.addf %47, %50 : vector<16x256xf32>
    %cst_34 = arith.constant 0.000000e+00 : f32
    %52 = vector.broadcast %cst_34 : f32 to vector<16x256xf32>
    %53 = arith.maximumf %51, %52 : vector<16x256xf32>
    %54 = arith.truncf %53 : vector<16x256xf32> to vector<16x256xbf16>
    %cst_35 = arith.constant dense<0.000000e+00> : vector<16x256xf32>
    %55 = tpu.matmul %54, %2, %cst_35 {dimension_numbers = #tpu.dot_dimension_numbers<[1], [0], [0], [1], [0, 0, 1, 1], [], []>} : vector<16x256xbf16>, vector<256x256xbf16>, vector<16x256xf32> -> vector<16x256xf32>
    %cst_36 = arith.constant dense<0.000000e+00> : vector<16x256xf32>
    %56 = tpu.matmul %54, %4, %cst_36 {dimension_numbers = #tpu.dot_dimension_numbers<[1], [0], [0], [1], [0, 0, 1, 1], [], []>} : vector<16x256xbf16>, vector<256x256xbf16>, vector<16x256xf32> -> vector<16x256xf32>
    %c48 = arith.constant 48 : index
    %c0_37 = arith.constant 0 : index
    %57 = vector.load %arg2[%c48, %c0_37] : memref<96x16xbf16, #tpu.memory_space<vmem>>, vector<16x16xbf16>
    %cst_38 = arith.constant dense<0.000000e+00> : vector<16x256xf32>
    %58 = tpu.matmul %57, %54, %cst_38 {dimension_numbers = #tpu.dot_dimension_numbers<[1], [0], [0], [1], [0, 0, 1, 1], [], []>} : vector<16x16xbf16>, vector<16x256xbf16>, vector<16x256xf32> -> vector<16x256xf32>
    %c64 = arith.constant 64 : index
    %c0_39 = arith.constant 0 : index
    %59 = vector.load %arg2[%c64, %c0_39] : memref<96x16xbf16, #tpu.memory_space<vmem>>, vector<16x16xbf16>
    %60 = arith.truncf %55 : vector<16x256xf32> to vector<16x256xbf16>
    %cst_40 = arith.constant dense<0.000000e+00> : vector<16x256xf32>
    %61 = tpu.matmul %59, %60, %cst_40 {dimension_numbers = #tpu.dot_dimension_numbers<[1], [0], [0], [1], [0, 0, 1, 1], [], []>} : vector<16x16xbf16>, vector<16x256xbf16>, vector<16x256xf32> -> vector<16x256xf32>
    %62 = arith.addf %58, %61 : vector<16x256xf32>
    %c80 = arith.constant 80 : index
    %c0_41 = arith.constant 0 : index
    %63 = vector.load %arg2[%c80, %c0_41] : memref<96x16xbf16, #tpu.memory_space<vmem>>, vector<16x16xbf16>
    %64 = arith.truncf %56 : vector<16x256xf32> to vector<16x256xbf16>
    %cst_42 = arith.constant dense<0.000000e+00> : vector<16x256xf32>
    %65 = tpu.matmul %63, %64, %cst_42 {dimension_numbers = #tpu.dot_dimension_numbers<[1], [0], [0], [1], [0, 0, 1, 1], [], []>} : vector<16x16xbf16>, vector<16x256xbf16>, vector<16x256xf32> -> vector<16x256xf32>
    %66 = arith.addf %62, %65 : vector<16x256xf32>
    %67 = vector.broadcast %13 : vector<1x256xf32> to vector<16x256xf32>
    %68 = arith.mulf %66, %67 : vector<16x256xf32>
    %cst_43 = arith.constant dense<0.000000e+00> : vector<16xf32>
    %69 = vector.multi_reduction <add>, %68, %cst_43 [1] : vector<16x256xf32> to vector<16xf32>
    %70 = vector.shape_cast %69 : vector<16xf32> to vector<16x1xf32>
    %71 = arith.mulf %68, %66 : vector<16x256xf32>
    %cst_44 = arith.constant dense<0.000000e+00> : vector<16xf32>
    %72 = vector.multi_reduction <add>, %71, %cst_44 [1] : vector<16x256xf32> to vector<16xf32>
    %73 = vector.shape_cast %72 : vector<16xf32> to vector<16x1xf32>
    %74 = tpu.concatenate %70, %73 in 1 : vector<16x1xf32>, vector<16x1xf32> -> vector<16x2xf32>
    %cst_45 = arith.constant dense<0.000000e+00> : vector<16x2xf32>
    %75 = tpu.matmul %5, %74, %cst_45 {dimension_numbers = #tpu.dot_dimension_numbers<[1], [0], [0], [1], [0, 0, 1, 1], [], []>} : vector<16x16xf32>, vector<16x2xf32>, vector<16x2xf32> -> vector<16x2xf32>
    %cst_46 = arith.constant 0.00173611112 : f32
    %76 = vector.broadcast %cst_46 : f32 to vector<16x2xf32>
    %77 = arith.mulf %75, %76 : vector<16x2xf32>
    %78 = vector.extract_strided_slice %77 {offsets = [0, 0], sizes = [16, 1], strides = [1, 1]} : vector<16x2xf32> to vector<16x1xf32>
    %79 = vector.extract_strided_slice %77 {offsets = [0, 1], sizes = [16, 1], strides = [1, 1]} : vector<16x2xf32> to vector<16x1xf32>
    %80 = arith.mulf %78, %78 : vector<16x1xf32>
    %81 = arith.subf %79, %80 : vector<16x1xf32>
    %cst_47 = arith.constant 9.99999974E-6 : f32
    %82 = vector.broadcast %cst_47 : f32 to vector<16x1xf32>
    %83 = arith.addf %81, %82 : vector<16x1xf32>
    %84 = math.rsqrt %83 : vector<16x1xf32>
    %85 = arith.mulf %9, %84 : vector<16x1xf32>
    %86 = vector.broadcast %85 : vector<16x1xf32> to vector<16x256xf32>
    %87 = arith.mulf %66, %86 : vector<16x256xf32>
    %88 = arith.mulf %78, %85 : vector<16x1xf32>
    %89 = arith.subf %10, %88 : vector<16x1xf32>
    %90 = vector.broadcast %89 : vector<16x1xf32> to vector<16x256xf32>
    %91 = arith.addf %87, %90 : vector<16x256xf32>
    %92 = arith.addf %91, %16 : vector<16x256xf32>
    %cst_48 = arith.constant 0.000000e+00 : f32
    %93 = vector.broadcast %cst_48 : f32 to vector<16x256xf32>
    %94 = arith.maximumf %92, %93 : vector<16x256xf32>
    %cst_49 = arith.constant dense<0.000000e+00> : vector<8x256xf32>
    %95 = tpu.matmul %6, %94, %cst_49 {dimension_numbers = #tpu.dot_dimension_numbers<[1], [0], [0], [1], [0, 0, 1, 1], [], []>} : vector<8x16xf32>, vector<16x256xf32>, vector<8x256xf32> -> vector<8x256xf32>
    %96 = vector.broadcast %11 : vector<1x1xf32> to vector<8x256xf32>
    %97 = arith.addf %95, %96 : vector<8x256xf32>
    %c0_50 = arith.constant 0 : index
    %c0_51 = arith.constant 0 : index
    %98 = vector.load %arg6[%c0_50, %c0_51] : memref<8x256xf32, #tpu.memory_space<vmem>>, vector<8x256xf32>
    tpu.vector_store %arg6[%c0_50, %c0_51], %97 {strides = array<i32>} : memref<8x256xf32, #tpu.memory_space<vmem>>, vector<8x256xf32>,
    return
  }
}

</mosaic_0001>

<bundles_post_ra>
// kernel: forward.1
= control target key start
LH: loop header
LB: loop body
LE: loop exit
PB: predicated region body
PF: predicated region fallthrough
CT: control target
= control target key end

     0   :  { %11 = vsyncpa [#allocation3], 0  ;;  %s1690_s24 = smov [#allocation2]   ;;  %s1691_s26 = smov 128   ;;  %s2168_s0 = inlined_call_operand.vmem [shape: f32[16,256], index: 0, kind: input, shape index: {}]   ;;  %s2169_s1 = inlined_call_operand.hbm [shape: bf16[2,256,256], index: 1, kind: input, shape index: {}]   ;;  %s2170_s2 = inlined_call_operand.vmem [shape: bf16[96,16], index: 2, kind: input, shape index: {}]   ;;  %s2171_s3 = inlined_call_operand.vmem [shape: f32[24,16], index: 3, kind: input, shape index: {}]   ;;  %s2172_s4 = inlined_call_operand.vmem [shape: f32[16,8], index: 4, kind: input, shape index: {}]   ;;  %s2173_s5 = inlined_call_operand.vmem [shape: f32[2,256], index: 5, kind: input, shape index: {}]   ;;  %s2174_s6 = inlined_call_operand.vmem [shape: f32[8,256], index: 6, kind: output, shape index: {}]  }
   0x1   :  { %s18_s23 = sshll.u32 %s2169_s1, 4  ;;  %s20_s25 = sshll.u32 %s1690_s24, 4  ;;  %s19_s23 = int_to_ptr.hbm [resolvable:$true] %s18_s23  ;;  %s21_s25 = int_to_ptr.vmem [resolvable:$true] %s20_s25 }
   0x2   :  { %s1692_s27 = smov 8  }
   0x3   :  { %26 = dma.hbm_to_vmem [thread:$0]  %s19_s23, 8192, %s21_s25, [#allocation3], %s1691_s26, %s1691_s26, %s1692_s27  }
   0x4   :  { %1688 = dma.done.wait [#allocation3], 8192  }
   0x5   :  { %1689 = vsyncadd [#allocation3], 4294959104  ;;  %v1323_v0 = vld [vmem:[#allocation2 + $0x70] sm:$0xf]  ;;  %v1578_v1 = vld [vmem:[#allocation2 + $0x74] sm:$0xf0] }
   0x6   :  { %v1387_v2 = vld [vmem:[#allocation2 + $0xf0] sm:$0xf]  ;;  %v1740_v3 = vor.u32 %v1578_v1, %v1323_v0  ;;  %v1594_v4 = vld [vmem:[#allocation2 + $0xf4] sm:$0xf0]  ;;  %v1577_v5 = vld [vmem:[#allocation2 + $0x74] sm:$0xf] }
   0x7   :  { %v1325_v6 = vld [vmem:[#allocation2 + $0x78] sm:$0xf0]  ;;  %v1742_v7 = vor.u32 %v1594_v4, %v1387_v2  ;;  %v1593_v9 = vld [vmem:[#allocation2 + $0xf4] sm:$0xf]  ;;  %v1315_v11 = vld [vmem:[#allocation2 + $0x60] sm:$0xf] }
   0x8   :  { %v1744_v8 = vor.u32 %v1577_v5, %v1325_v6  ;;  %v1389_v10 = vld [vmem:[#allocation2 + $0xf8] sm:$0xf0]  ;;  %280 = vmatpush.bf16.msra.mxu0 %v1740_v3  ;;  %v1576_v13 = vld [vmem:[#allocation2 + $0x64] sm:$0xf0]  ;;  %v1379_v14 = vld [vmem:[#allocation2 + $0xe0] sm:$0xf] }
   0x9   :  { %v1747_v12 = vor.u32 %v1593_v9, %v1389_v10  ;;  %v1592_v15 = vld [vmem:[#allocation2 + $0xe4] sm:$0xf0]  ;;  %294 = vmatpush.bf16.msra.mxu1 %v1742_v7  ;;  %v1751_v16 = vor.u32 %v1576_v13, %v1315_v11  ;;  %v1575_v18 = vld [vmem:[#allocation2 + $0x64] sm:$0xf]  ;;  %v1317_v19 = vld [vmem:[#allocation2 + $0x68] sm:$0xf0] }
   0xa   :  { %308 = vmatpush.bf16.msra.mxu2 %v1744_v8  ;;  %v1753_v17 = vor.u32 %v1592_v15, %v1379_v14  ;;  %v1591_v20 = vld [vmem:[#allocation2 + $0xe4] sm:$0xf]  ;;  %v1756_v21 = vor.u32 %v1575_v18, %v1317_v19  ;;  %v1381_v22 = vld [vmem:[#allocation2 + $0xe8] sm:$0xf0]  ;;  %v1307_v23 = vld [vmem:[#allocation2 + $0x50] sm:$0xf] }
   0xb   :  { %2188 = vst [vmem:[#allocation5_spill] sm:$0xff] %v1747_v12  ;;  %322 = vmatpush.bf16.msra.mxu3 %v1747_v12  ;;  %v1574_v24 = vld [vmem:[#allocation2 + $0x54] sm:$0xf0]  ;;  %v1758_v25 = vor.u32 %v1591_v20, %v1381_v22  ;;  %v1371_v26 = vld [vmem:[#allocation2 + $0xd0] sm:$0xf]  ;;  %vm563_vm0 = vcmask 130048  }
   0xc   :  { %v1590_v27 = vld [vmem:[#allocation2 + $0xd4] sm:$0xf0]  ;;  %v1573_v28 = vld [vmem:[#allocation2 + $0x54] sm:$0xf]  ;;  %281 = vmatpush.bf16.msra.mxu0 %v1751_v16  ;;  %v1761_v29 = vor.u32 %v1574_v24, %v1307_v23  ;;  %v1309_v30 = vld [vmem:[#allocation2 + $0x58] sm:$0xf0] }
   0xd   :  { %2189 = vst [vmem:[#allocation6_spill] sm:$0xff] %v1758_v25  ;;  %v1589_v31 = vld [vmem:[#allocation2 + $0xd4] sm:$0xf]  ;;  %v1373_v32 = vld [vmem:[#allocation2 + $0xd8] sm:$0xf0]  ;;  %295 = vmatpush.bf16.msra.mxu1 %v1753_v17  ;;  %v1765_v33 = vor.u32 %v1590_v27, %v1371_v26  ;;  %v1767_v34 = vor.u32 %v1573_v28, %v1309_v30  ;;  %vm700_vm1 = vcmask 7168  }
   0xe   :  { %309 = vmatpush.bf16.msra.mxu2 %v1756_v21  ;;  %v1299_v35 = vld [vmem:[#allocation2 + $0x40] sm:$0xf]  ;;  %v1572_v36 = vld [vmem:[#allocation2 + $0x44] sm:$0xf0]  ;;  %v1770_v38 = vor.u32 %v1589_v31, %v1373_v32  ;;  %v1571_v40 = vld [vmem:[#allocation2 + $0x44] sm:$0xf] }
   0xf   :  { %v1363_v37 = vld [vmem:[#allocation2 + $0xc0] sm:$0xf]  ;;  %323 = vmatpush.bf16.msra.mxu3 %v1758_v25  ;;  %v1588_v39 = vld [vmem:[#allocation2 + $0xc4] sm:$0xf0]  ;;  %v1301_v41 = vld [vmem:[#allocation2 + $0x48] sm:$0xf0]  ;;  %v1773_v44 = vor.u32 %v1572_v36, %v1299_v35 }
  0x10   :  { %2190 = vst [vmem:[#allocation7_spill] sm:$0xff] %v1770_v38  ;;  %v1587_v42 = vld [vmem:[#allocation2 + $0xc4] sm:$0xf]  ;;  %v1365_v43 = vld [vmem:[#allocation2 + $0xc8] sm:$0xf0]  ;;  %282 = vmatpush.bf16.msra.mxu0 %v1761_v29  ;;  %v1777_v45 = vor.u32 %v1588_v39, %v1363_v37  ;;  %v1779_v46 = vor.u32 %v1571_v40, %v1301_v41  ;;  %s1693_s22 = smov 1  }
  0x11   :  { %296 = vmatpush.bf16.msra.mxu1 %v1765_v33  ;;  %v1291_v47 = vld [vmem:[#allocation2 + $0x30] sm:$0xf]  ;;  %v1570_v48 = vld [vmem:[#allocation2 + $0x34] sm:$0xf0]  ;;  %v1782_v50 = vor.u32 %v1587_v42, %v1365_v43  ;;  %v1569_v52 = vld [vmem:[#allocation2 + $0x34] sm:$0xf] }
  0x12   :  { %310 = vmatpush.bf16.msra.mxu2 %v1767_v34  ;;  %v1355_v49 = vld [vmem:[#allocation2 + $0xb0] sm:$0xf]  ;;  %v1586_v51 = vld [vmem:[#allocation2 + $0xb4] sm:$0xf0]  ;;  %v1293_v53 = vld [vmem:[#allocation2 + $0x38] sm:$0xf0]  ;;  %v1785_v56 = vor.u32 %v1570_v48, %v1291_v47 }
  0x13   :  { %324 = vmatpush.bf16.msra.mxu3 %v1770_v38  ;;  %2191 = vst [vmem:[#allocation8_spill] sm:$0xff] %v1782_v50  ;;  %v1585_v54 = vld [vmem:[#allocation2 + $0xb4] sm:$0xf]  ;;  %v1357_v55 = vld [vmem:[#allocation2 + $0xb8] sm:$0xf0]  ;;  %v1789_v57 = vor.u32 %v1586_v51, %v1355_v49  ;;  %v1791_v58 = vor.u32 %v1569_v52, %v1293_v53  ;;  %s1694_s23 = smov 127  }
  0x14   :  { %283 = vmatpush.bf16.msra.mxu0 %v1773_v44  ;;  %v1283_v59 = vld [vmem:[#allocation2 + $0x20] sm:$0xf]  ;;  %v1568_v60 = vld [vmem:[#allocation2 + $0x24] sm:$0xf0]  ;;  %v1794_v62 = vor.u32 %v1585_v54, %v1357_v55  ;;  %v1567_v0 = vld [vmem:[#allocation2 + $0x24] sm:$0xf] }
  0x15   :  { %297 = vmatpush.bf16.msra.mxu1 %v1777_v45  ;;  %v1347_v61 = vld [vmem:[#allocation2 + $0xa0] sm:$0xf]  ;;  %v1584_v63 = vld [vmem:[#allocation2 + $0xa4] sm:$0xf0]  ;;  %v1285_v1 = vld [vmem:[#allocation2 + $0x28] sm:$0xf0]  ;;  %v1797_v5 = vor.u32 %v1568_v60, %v1283_v59 }
  0x16   :  { %311 = vmatpush.bf16.msra.mxu2 %v1779_v46  ;;  %2192 = vst [vmem:[#allocation9_spill] sm:$0xff] %v1794_v62  ;;  %v1583_v2 = vld [vmem:[#allocation2 + $0xa4] sm:$0xf]  ;;  %v1349_v4 = vld [vmem:[#allocation2 + $0xa8] sm:$0xf0]  ;;  %v1801_v6 = vor.u32 %v1584_v63, %v1347_v61  ;;  %v1803_v9 = vor.u32 %v1567_v0, %v1285_v1  ;;  %v42_v59 = vld [vmem:[%s2168_s0 + $0x10] sm:$0xff] }
  0x17   :  { %325 = vmatpush.bf16.msra.mxu3 %v1782_v50  ;;  %v1275_v10 = vld [vmem:[#allocation2 + $0x10] sm:$0xf]  ;;  %v1566_v11 = vld [vmem:[#allocation2 + $0x14] sm:$0xf0]  ;;  %v1806_v14 = vor.u32 %v1583_v2, %v1349_v4  ;;  %v1565_v18 = vld [vmem:[#allocation2 + $0x14] sm:$0xf] }
  0x18   :  { %284 = vmatpush.bf16.msra.mxu0 %v1785_v56  ;;  %v1339_v13 = vld [vmem:[#allocation2 + $0x90] sm:$0xf]  ;;  %v1582_v15 = vld [vmem:[#allocation2 + $0x94] sm:$0xf0]  ;;  %v1277_v19 = vld [vmem:[#allocation2 + $0x18] sm:$0xf0]  ;;  %v1809_v23 = vor.u32 %v1566_v11, %v1275_v10 }
  0x19   :  { %298 = vmatpush.bf16.msra.mxu1 %v1789_v57  ;;  %2193 = vst [vmem:[#allocation10_spill] sm:$0xff] %v1806_v14  ;;  %v1581_v20 = vld [vmem:[#allocation2 + $0x94] sm:$0xf]  ;;  %v1341_v22 = vld [vmem:[#allocation2 + $0x98] sm:$0xf0]  ;;  %v1813_v28 = vor.u32 %v1582_v15, %v1339_v13  ;;  %v1815_v30 = vor.u32 %v1565_v18, %v1277_v19  ;;  %v40_v55 = vld [vmem:[%s2168_s0] sm:$0xff] }
  0x1a   :  { %312 = vmatpush.bf16.msra.mxu2 %v1791_v58  ;;  %v1267_v24 = vld [vmem:[#allocation2] sm:$0xf]  ;;  %v1564_v26 = vld [vmem:[#allocation2 + $0x4] sm:$0xf0]  ;;  %v1563_v32 = vld [vmem:[#allocation2 + $0x4] sm:$0xf]  ;;  %v1818_v36 = vor.u32 %v1581_v20, %v1341_v22  ;;  %v1853_v20 = vpack.c.bf16 %v42_v59, %v40_v55 }
  0x1b   :  { %326 = vmatpush.bf16.msra.mxu3 %v1794_v62  ;;  %v1331_v27 = vld [vmem:[#allocation2 + $0x80] sm:$0xf]  ;;  %v1580_v31 = vld [vmem:[#allocation2 + $0x84] sm:$0xf0]  ;;  %v1269_v35 = vld [vmem:[#allocation2 + $0x8] sm:$0xf0]  ;;  %v1821_v47 = vor.u32 %v1564_v26, %v1267_v24 }
  0x1c   :  { %285 = vmatpush.bf16.msra.mxu0 %v1797_v5  ;;  %2194 = vst [vmem:[#allocation11_spill] sm:$0xff] %v1818_v36  ;;  %v1579_v37 = vld [vmem:[#allocation2 + $0x84] sm:$0xf]  ;;  %v1333_v39 = vld [vmem:[#allocation2 + $0x88] sm:$0xf0]  ;;  %v1825_v52 = vor.u32 %v1580_v31, %v1331_v27  ;;  %v1827_v53 = vor.u32 %v1563_v32, %v1269_v35  ;;  %v43_v0 = vld [vmem:[%s2168_s0 + $0x18] sm:$0xff] }
  0x1d   :  { %299 = vmatpush.bf16.msra.mxu1 %v1801_v6  ;;  %v1451_v40 = vld [vmem:[#allocation2 + $0x170] sm:$0xf]  ;;  %v1610_v41 = vld [vmem:[#allocation2 + $0x174] sm:$0xf0]  ;;  %v1609_v48 = vld [vmem:[#allocation2 + $0x174] sm:$0xf]  ;;  %v1836_v60 = vor.u32 %v1579_v37, %v1333_v39 }
  0x1e   :  { %313 = vmatpush.bf16.msra.mxu2 %v1803_v9  ;;  %v1515_v42 = vld [vmem:[#allocation2 + $0x1f0] sm:$0xf]  ;;  %v1626_v43 = vld [vmem:[#allocation2 + $0x1f4] sm:$0xf0]  ;;  %v1453_v49 = vld [vmem:[#allocation2 + $0x178] sm:$0xf0]  ;;  %v1838_v61 = vor.u32 %v1610_v41, %v1451_v40 }
  0x1f   :  { %327 = vmatpush.bf16.msra.mxu3 %v1806_v14  ;;  %v1625_v51 = vld [vmem:[#allocation2 + $0x1f4] sm:$0xf]  ;;  %v1517_v54 = vld [vmem:[#allocation2 + $0x1f8] sm:$0xf0]  ;;  %2195 = vst [vmem:[#allocation12_spill] sm:$0xff] %v1836_v60  ;;  %v41_v63 = vld [vmem:[%s2168_s0 + $0x8] sm:$0xff]  ;;  %v1846_v1 = vor.u32 %v1626_v43, %v1515_v42  ;;  %v1848_v2 = vor.u32 %v1609_v48, %v1453_v49 }
  0x20   :  { %286 = vmatpush.bf16.msra.mxu0 %v1809_v23  ;;  %v1443_v4 = vld [vmem:[#allocation2 + $0x160] sm:$0xf]  ;;  %v1608_v10 = vld [vmem:[#allocation2 + $0x164] sm:$0xf0]  ;;  %v1851_v13 = vor.u32 %v1625_v51, %v1517_v54  ;;  %v1607_v18 = vld [vmem:[#allocation2 + $0x164] sm:$0xf]  ;;  %v1857_v26 = vpack.c.bf16 %v43_v0, %v41_v63 }
  0x21   :  { %300 = vmatpush.bf16.msra.mxu1 %v1813_v28  ;;  %v1507_v11 = vld [vmem:[#allocation2 + $0x1e0] sm:$0xf]  ;;  %v1624_v15 = vld [vmem:[#allocation2 + $0x1e4] sm:$0xf0]  ;;  %v1445_v19 = vld [vmem:[#allocation2 + $0x168] sm:$0xf0]  ;;  %v1861_v27 = vor.u32 %v1608_v10, %v1443_v4 }
  0x22   :  { %314 = vmatpush.bf16.msra.mxu2 %v1815_v30  ;;  %2196 = vst [vmem:[#allocation13_spill] sm:$0xff] %v1851_v13  ;;  %v1623_v22 = vld [vmem:[#allocation2 + $0x1e4] sm:$0xf]  ;;  %v1509_v24 = vld [vmem:[#allocation2 + $0x1e8] sm:$0xf0]  ;;  %v1865_v31 = vor.u32 %v1624_v15, %v1507_v11  ;;  %v1867_v32 = vor.u32 %v1607_v18, %v1445_v19  ;;  %s1701_s12 = smov 124  }
  0x23   :  { %328 = vmatpush.bf16.msra.mxu3 %v1818_v36  ;;  %v1435_v35 = vld [vmem:[#allocation2 + $0x150] sm:$0xf]  ;;  %v1606_v37 = vld [vmem:[#allocation2 + $0x154] sm:$0xf0]  ;;  %v1870_v40 = vor.u32 %v1623_v22, %v1509_v24  ;;  %v1605_v42 = vld [vmem:[#allocation2 + $0x154] sm:$0xf] }
  0x24   :  { %287 = vmatpush.bf16.msra.mxu0 %v1821_v47  ;;  %v1499_v39 = vld [vmem:[#allocation2 + $0x1d0] sm:$0xf]  ;;  %v1622_v41 = vld [vmem:[#allocation2 + $0x1d4] sm:$0xf0]  ;;  %v1437_v43 = vld [vmem:[#allocation2 + $0x158] sm:$0xf0]  ;;  %v1876_v51 = vor.u32 %v1606_v37, %v1435_v35 }
  0x25   :  { %301 = vmatpush.bf16.msra.mxu1 %v1825_v52  ;;  %2197 = vst [vmem:[#allocation14_spill] sm:$0xff] %v1870_v40  ;;  %v1621_v48 = vld [vmem:[#allocation2 + $0x1d4] sm:$0xf]  ;;  %v1501_v49 = vld [vmem:[#allocation2 + $0x1d8] sm:$0xf0]  ;;  %v1881_v54 = vor.u32 %v1622_v41, %v1499_v39  ;;  %v1883_v55 = vor.u32 %v1605_v42, %v1437_v43 }
  0x26   :  { %315 = vmatpush.bf16.msra.mxu2 %v1827_v53  ;;  %v1427_v59 = vld [vmem:[#allocation2 + $0x140] sm:$0xf]  ;;  %v1604_v63 = vld [vmem:[#allocation2 + $0x144] sm:$0xf0]  ;;  %v1886_v4 = vor.u32 %v1621_v48, %v1501_v49  ;;  %v1603_v11 = vld [vmem:[#allocation2 + $0x144] sm:$0xf] }
  0x27   :  { %329 = vmatpush.bf16.msra.mxu3 %v1836_v60  ;;  %288 = vmatmul.bf16.vlgmr.msra.gmra.mxu0 %v1853_v20  ;;  %v1491_v0 = vld [vmem:[#allocation2 + $0x1c0] sm:$0xf]  ;;  %v1620_v10 = vld [vmem:[#allocation2 + $0x1c4] sm:$0xf0]  ;;  %v1429_v15 = vld [vmem:[#allocation2 + $0x148] sm:$0xf0]  ;;  %v1889_v22 = vor.u32 %v1604_v63, %v1427_v59 }
  0x28   :  { %496 = vmatpush.bf16.msrb.mxu0 %v1838_v61  ;;  %302 = vmatmul.bf16.vlgmr.msra.gmra.mxu1 %v1857_v26  ;;  %2198 = vst [vmem:[#allocation15_spill] sm:$0xff] %v1886_v4  ;;  %v1619_v18 = vld [vmem:[#allocation2 + $0x1c4] sm:$0xf]  ;;  %v1493_v19 = vld [vmem:[#allocation2 + $0x1c8] sm:$0xf0]  ;;  %v1893_v24 = vor.u32 %v1620_v10, %v1491_v0  ;;  %v1895_v35 = vor.u32 %v1603_v11, %v1429_v15 }
  0x29   :  { %510 = vmatpush.bf16.msrb.mxu1 %v1846_v1  ;;  %316 = vmatmul.bf16.vlgmr.msra.gmra.mxu2 %v1853_v20  ;;  %v1419_v37 = vld [vmem:[#allocation2 + $0x130] sm:$0xf]  ;;  %v1602_v39 = vld [vmem:[#allocation2 + $0x134] sm:$0xf0]  ;;  %v1898_v42 = vor.u32 %v1619_v18, %v1493_v19  ;;  %v1601_v48 = vld [vmem:[#allocation2 + $0x134] sm:$0xf] }
  0x2a   :  { %524 = vmatpush.bf16.msrb.mxu2 %v1848_v2  ;;  %330 = vmatmul.bf16.vlgmr.msra.gmra.mxu3 %v1857_v26  ;;  %v1483_v41 = vld [vmem:[#allocation2 + $0x1b0] sm:$0xf]  ;;  %v1618_v43 = vld [vmem:[#allocation2 + $0x1b4] sm:$0xf0]  ;;  %v1421_v49 = vld [vmem:[#allocation2 + $0x138] sm:$0xf0] }
  0x2b   :  { %538 = vmatpush.bf16.msrb.mxu3 %v1851_v13  ;;  %2199 = vst [vmem:[#allocation16_spill] sm:$0xff] %v1898_v42  ;;  %v1617_v59 = vld [vmem:[#allocation2 + $0x1b4] sm:$0xf]  ;;  %v1485_v63 = vld [vmem:[#allocation2 + $0x1b8] sm:$0xf0]  ;;  %v1905_v0 = vor.u32 %v1618_v43, %v1483_v41  ;;  %v1907_v10 = vor.u32 %v1601_v48, %v1421_v49 }
  0x2c   :  { %497 = vmatpush.bf16.msrb.mxu0 %v1861_v27  ;;  %v1411_v11 = vld [vmem:[#allocation2 + $0x120] sm:$0xf]  ;;  %v1600_v15 = vld [vmem:[#allocation2 + $0x124] sm:$0xf0]  ;;  %v1910_v19 = vor.u32 %v1617_v59, %v1485_v63  ;;  %v1599_v13 = vld [vmem:[#allocation2 + $0x124] sm:$0xf] }
  0x2d   :  { %511 = vmatpush.bf16.msrb.mxu1 %v1865_v31  ;;  %v1475_v18 = vld [vmem:[#allocation2 + $0x1a0] sm:$0xf]  ;;  %v1413_v60 = vld [vmem:[#allocation2 + $0x128] sm:$0xf0]  ;;  %v1913_v36 = vor.u32 %v1600_v15, %v1411_v11  ;;  %v1403_v48 = vld [vmem:[#allocation2 + $0x110] sm:$0xf] }
  0x2e   :  { %525 = vmatpush.bf16.msrb.mxu2 %v1867_v32  ;;  %2200 = vst [vmem:[#allocation17_spill] sm:$0xff] %v1910_v19  ;;  %v1919_v43 = vor.u32 %v1599_v13, %v1413_v60  ;;  %v1598_v49 = vld [vmem:[#allocation2 + $0x114] sm:$0xf0]  ;;  %v1467_v59 = vld [vmem:[#allocation2 + $0x190] sm:$0xf] }
  0x2f   :  { %539 = vmatpush.bf16.msrb.mxu3 %v1870_v40  ;;  %v1901_v40 = vor.u32 %v1602_v39, %v1419_v37  ;;  %v1615_v37 = vld [vmem:[#allocation2 + $0x1a4] sm:$0xf]  ;;  %v1477_v39 = vld [vmem:[#allocation2 + $0x1a8] sm:$0xf0]  ;;  %v1597_v14 = vld [vmem:[#allocation2 + $0x114] sm:$0xf]  ;;  %v1404_v50 = vor.u32 %v1598_v49, %v1403_v48 }
  0x30   :  { %498 = vmatpush.bf16.msrb.mxu0 %v1876_v51  ;;  %v1922_v63 = vor.u32 %v1615_v37, %v1477_v39  ;;  %v1405_v62 = vld [vmem:[#allocation2 + $0x118] sm:$0xf0]  ;;  %v1613_v11 = vld [vmem:[#allocation2 + $0x194] sm:$0xf]  ;;  %v1459_v37 = vld [vmem:[#allocation2 + $0x180] sm:$0xf] }
  0x31   :  { %512 = vmatpush.bf16.msrb.mxu1 %v1881_v54  ;;  %v1469_v15 = vld [vmem:[#allocation2 + $0x198] sm:$0xf0]  ;;  %v1929_v13 = vor.u32 %v1597_v14, %v1405_v62  ;;  %v1595_v38 = vld [vmem:[#allocation2 + $0x104] sm:$0xf]  ;;  %v1397_v25 = vld [vmem:[#allocation2 + $0x108] sm:$0xf0] }
  0x32   :  { %526 = vmatpush.bf16.msrb.mxu2 %v1883_v55  ;;  %v1932_v39 = vor.u32 %v1613_v11, %v1469_v15  ;;  %v1611_v12 = vld [vmem:[#allocation2 + $0x184] sm:$0xf]  ;;  %v1461_v48 = vld [vmem:[#allocation2 + $0x188] sm:$0xf0]  ;;  %v1938_v14 = vor.u32 %v1595_v38, %v1397_v25 }
  0x33   :  { %540 = vmatpush.bf16.msrb.mxu3 %v1886_v4  ;;  %v1616_v4 = vld [vmem:[#allocation2 + $0x1a4] sm:$0xf0] }
  0x34   :  { %499 = vmatpush.bf16.msrb.mxu0 %v1889_v22  ;;  %v1917_v41 = vor.u32 %v1616_v4, %v1475_v18  ;;  %v1395_v4 = vld [vmem:[#allocation2 + $0x100] sm:$0xf]  ;;  %v1596_v18 = vld [vmem:[#allocation2 + $0x104] sm:$0xf0] }
  0x35   :  { %513 = vmatpush.bf16.msrb.mxu1 %v1893_v24  ;;  %v1396_v49 = vor.u32 %v1596_v18, %v1395_v4  ;;  %v1629_v18 = vld [vmem:[%s2170_s2 + $0x10] sm:$0xff] }
  0x36   :  { %527 = vmatpush.bf16.msrb.mxu2 %v1895_v35 }
  0x37   :  { %541 = vmatpush.bf16.msrb.mxu3 %v1898_v42  ;;  %v1614_v42 = vld [vmem:[#allocation2 + $0x194] sm:$0xf0] }
  0x38   :  { %500 = vmatpush.bf16.msrb.mxu0 %v1901_v40  ;;  %v1927_v60 = vor.u32 %v1614_v42, %v1467_v59  ;;  %v1941_v42 = vor.u32 %v1611_v12, %v1461_v48  ;;  %v1627_v12 = vld [vmem:[%s2170_s2] sm:$0xff] }
  0x39   :  { %514 = vmatpush.bf16.msrb.mxu1 %v1905_v0 }
  0x3a   :  { %528 = vmatpush.bf16.msrb.mxu2 %v1907_v10 }
  0x3b   :  { %542 = vmatpush.bf16.msrb.mxu3 %v1910_v19  ;;  %v1612_v19 = vld [vmem:[#allocation2 + $0x184] sm:$0xf0] }
  0x3c   :  { %501 = vmatpush.bf16.msrb.mxu0 %v1913_v36  ;;  %v1936_v62 = vor.u32 %v1612_v19, %v1459_v37 }
  0x3d   :  { %515 = vmatpush.bf16.msrb.mxu1 %v1917_v41 }
  0x3e   :  { %529 = vmatpush.bf16.msrb.mxu2 %v1919_v43 }
  0x3f   :  { %543 = vmatpush.bf16.msrb.mxu3 %v1922_v63 }
  0x40   :  { %502 = vmatpush.bf16.msrb.mxu0 %v1404_v50 }
  0x41   :  { %516 = vmatpush.bf16.msrb.mxu1 %v1927_v60 }
  0x42   :  { %530 = vmatpush.bf16.msrb.mxu2 %v1929_v13 }
  0x43   :  { %544 = vmatpush.bf16.msrb.mxu3 %v1932_v39 }
  0x44   :  { %503 = vmatpush.bf16.msrb.mxu0 %v1396_v49 }
  0x45   :  { %517 = vmatpush.bf16.msrb.mxu1 %v1936_v62 }
  0x46   :  { %531 = vmatpush.bf16.msrb.mxu2 %v1938_v14 }
  0x47   :  { %545 = vmatpush.bf16.msrb.mxu3 %v1941_v42  ;;  %504 = vmatmul.bf16.vlgmr.msrb.gmra.mxu0 %v1853_v20 }
  0x48   :  { %518 = vmatmul.bf16.vlgmr.msrb.gmra.mxu1 %v1857_v26 }
  0x49   :  { %532 = vmatmul.bf16.vlgmr.msrb.gmra.mxu2 %v1853_v20 }
  0x4a   :  { %610 = vmatpush.bf16.msra.mxu2 %v1853_v20  ;;  %546 = vmatmul.bf16.vlgmr.msrb.gmra.mxu3 %v1857_v26  ;;  %v1628_v20 = vld [vmem:[%s2170_s2 + $0x8] sm:$0xff] }
  0x4b   :  { %624 = vmatpush.bf16.msra.mxu3 %v1857_v26 }
  0x4f   :  { %824 = vmatpush.bf16.msrb.mxu3 %v1740_v3 }
  0x53   :  { %825 = vmatpush.bf16.msrb.mxu3 %v1751_v16 }
  0x57   :  { %826 = vmatpush.bf16.msrb.mxu3 %v1761_v29 }
  0x59   :  { %1531 = vmatmul.msk.bf16.vlgmr.msra.gmra.mxu2 %vm563_vm0, %v1627_v12 }
  0x5a   :  { %1532 = vmatmul.msk.bf16.vlgmr.msra.gmra.mxu3 %vm563_vm0, %v1627_v12 }
  0x5b   :  { %827 = vmatpush.bf16.msrb.mxu3 %v1773_v44 }
  0x5f   :  { %828 = vmatpush.bf16.msrb.mxu3 %v1785_v56 }
  0x63   :  { %829 = vmatpush.bf16.msrb.mxu3 %v1797_v5 }
  0x67   :  { %830 = vmatpush.bf16.msrb.mxu3 %v1809_v23 }
  0x6b   :  { %831 = vmatpush.bf16.msrb.mxu3 %v1821_v47 }
  0x6f   :  { %880 = vmatpush.bf16.msra.mxu3 %v1838_v61 }
  0x73   :  { %881 = vmatpush.bf16.msra.mxu3 %v1861_v27 }
  0x77   :  { %882 = vmatpush.bf16.msra.mxu3 %v1876_v51 }
  0x7b   :  { %883 = vmatpush.bf16.msra.mxu3 %v1889_v22 }
  0x7f   :  { %884 = vmatpush.bf16.msra.mxu3 %v1901_v40 }
  0x83   :  { %885 = vmatpush.bf16.msra.mxu3 %v1913_v36 }
  0x87   :  { %886 = vmatpush.bf16.msra.mxu3 %v1404_v50 }
  0x8b   :  { %887 = vmatpush.bf16.msra.mxu3 %v1396_v49 }
  0xa4   :  { %v289_v3 = vpop.f32.mrf.mxu0 }
  0xa5   :  { %v303_v16 = vpop.f32.mrf.mxu1 }
  0xa6   :  { %v304_v38 = vadd.f32 %v303_v16, %v289_v3 }
  0xac   :  { %v317_v25 = vpop.f32.mrf.mxu2  ;;  %v291_v44 = vpop.f32.mrf.mxu0 }
  0xad   :  { %v331_v29 = vpop.f32.mrf.mxu3  ;;  %v305_v56 = vpop.f32.mrf.mxu1 }
  0xae   :  { %v306_v5 = vadd.f32 %v305_v56, %v291_v44  ;;  %v332_v47 = vadd.f32 %v331_v29, %v317_v25 }
  0xb0   :  { %v556_v23 = vpack.c.bf16 %v306_v5, %v304_v38 }
  0xb2   :  { %574 = vmatpush.bf16.msra.mxu0 %v556_v23 }
  0xb4   :  { %v319_v61 = vpop.f32.mrf.mxu2 }
  0xb5   :  { %v333_v26 = vpop.f32.mrf.mxu3  ;;  %1525 = vmatmul.msk.bf16.vlgmr.msra.gmra.mxu0 %vm563_vm0, %v1628_v20 }
  0xb6   :  { %v334_v27 = vadd.f32 %v333_v26, %v319_v61  ;;  %v2057_v26 = vld [vmem:[%s2171_s3 + $0x8] sm:$0xff] }
  0xb8   :  { %v557_v40 = vpack.c.bf16 %v334_v27, %v332_v47  ;;  %v2048_v47 = vld [vmem:[%s2171_s3] sm:$0xff]  ;;  %v2202_v27 = vld [vmem:[#allocation6_spill] sm:$0xff] }
  0xba   :  { %588 = vmatpush.bf16.msra.mxu1 %v557_v40  ;;  %v2203_v40 = vld [vmem:[#allocation7_spill] sm:$0xff] }
  0xbd   :  { %1526 = vmatmul.msk.bf16.vlgmr.msra.gmra.mxu1 %vm563_vm0, %v1628_v20  ;;  %v2201_v20 = vld [vmem:[#allocation5_spill] sm:$0xff] }
  0xc4   :  { %v505_v36 = vpop.f32.mrf.mxu0 }
  0xc5   :  { %v519_v51 = vpop.f32.mrf.mxu1 }
  0xc6   :  { %v1976_v11 = vadd.f32 %v519_v51, %v505_v36  ;;  %v2204_v36 = vld [vmem:[#allocation8_spill] sm:$0xff]  ;;  %v2205_v51 = vld [vmem:[#allocation9_spill] sm:$0xff] }
  0xcc   :  { %v533_v22 = vpop.f32.mrf.mxu2  ;;  %v507_v19 = vpop.f32.mrf.mxu0 }
  0xcd   :  { %v547_v50 = vpop.f32.mrf.mxu3  ;;  %v521_v59 = vpop.f32.mrf.mxu1 }
  0xce   :  { %v1978_v15 = vadd.f32 %v521_v59, %v507_v19  ;;  %v1986_v49 = vadd.f32 %v547_v50, %v533_v22  ;;  %v2206_v22 = vld [vmem:[#allocation10_spill] sm:$0xff]  ;;  %v2207_v50 = vld [vmem:[#allocation11_spill] sm:$0xff]  ;;  %v2208_v19 = vld [vmem:[#allocation12_spill] sm:$0xff] }
  0xcf   :  { %v2209_v59 = vld [vmem:[#allocation13_spill] sm:$0xff] }
  0xd0   :  { %v633_v4 = vpack.c.bf16 %v1978_v15, %v1976_v11 }
  0xd2   :  { %650 = vmatpush.bf16.msrb.mxu0 %v633_v4  ;;  %v2210_v4 = vld [vmem:[#allocation14_spill] sm:$0xff] }
  0xd4   :  { %v535_v37 = vpop.f32.mrf.mxu2 }
  0xd5   :  { %v549_v48 = vpop.f32.mrf.mxu3  ;;  %1537 = vmatmul.msk.bf16.vlgmr.msrb.gmra.mxu0 %vm563_vm0, %v1629_v18 }
  0xd6   :  { %838 = vmatpush.bf16.msra.mxu0 %v1742_v7  ;;  %v1988_v12 = vadd.f32 %v549_v48, %v535_v37  ;;  %v2212_v37 = vld [vmem:[#allocation16_spill] sm:$0xff]  ;;  %v2213_v48 = vld [vmem:[#allocation17_spill] sm:$0xff] }
  0xd8   :  { %v634_v3 = vpack.c.bf16 %v1988_v12, %v1986_v49 }
  0xda   :  { %839 = vmatpush.bf16.msra.mxu0 %v1753_v17  ;;  %664 = vmatpush.bf16.msrb.mxu1 %v634_v3 }
  0xdd   :  { %1538 = vmatmul.msk.bf16.vlgmr.msrb.gmra.mxu1 %vm563_vm0, %v1629_v18  ;;  %v2211_v18 = vld [vmem:[#allocation15_spill] sm:$0xff] }
  0xde   :  { %852 = vmatpush.bf16.msra.mxu1 %v1744_v8  ;;  %840 = vmatpush.bf16.msra.mxu0 %v1765_v33 }
  0xe2   :  { %853 = vmatpush.bf16.msra.mxu1 %v1756_v21  ;;  %841 = vmatpush.bf16.msra.mxu0 %v1777_v45  ;;  %v612_v21 = vpop.f32.mrf.mxu2 }
  0xe6   :  { %854 = vmatpush.bf16.msra.mxu1 %v1767_v34  ;;  %842 = vmatpush.bf16.msra.mxu0 %v1789_v57  ;;  %v626_v34 = vpop.f32.mrf.mxu3 }
  0xea   :  { %855 = vmatpush.bf16.msra.mxu1 %v1779_v46  ;;  %843 = vmatpush.bf16.msra.mxu0 %v1801_v6  ;;  %v115_v46 = vld [vmem:[%s2173_s5] ss:$2 sm:$0x3] }
  0xee   :  { %856 = vmatpush.bf16.msra.mxu1 %v1791_v58  ;;  %844 = vmatpush.bf16.msra.mxu0 %v1813_v28  ;;  %v677_v28 = vperm.slane %v115_v46, 1 }
  0xf2   :  { %857 = vmatpush.bf16.msra.mxu1 %v1803_v9  ;;  %845 = vmatpush.bf16.msra.mxu0 %v1825_v52  ;;  %v676_v9 = vperm.slane %v115_v46, 0 }
  0xf6   :  { %894 = vmatpush.bf16.msrb.mxu0 %v1846_v1  ;;  %858 = vmatpush.bf16.msra.mxu1 %v1815_v30 }
  0xfa   :  { %895 = vmatpush.bf16.msrb.mxu0 %v1865_v31  ;;  %859 = vmatpush.bf16.msra.mxu1 %v1827_v53  ;;  %v614_v53 = vpop.f32.mrf.mxu2  ;;  %v628_v31 = vpop.f32.mrf.mxu3 }
  0xfe   :  { %908 = vmatpush.bf16.msrb.mxu1 %v1848_v2  ;;  %896 = vmatpush.bf16.msrb.mxu0 %v1881_v54 }
 0x102   :  { %909 = vmatpush.bf16.msrb.mxu1 %v1867_v32  ;;  %897 = vmatpush.bf16.msrb.mxu0 %v1893_v24 }
 0x106   :  { %910 = vmatpush.bf16.msrb.mxu1 %v1883_v55  ;;  %898 = vmatpush.bf16.msrb.mxu0 %v1905_v0 }
 0x10a   :  { %911 = vmatpush.bf16.msrb.mxu1 %v1895_v35  ;;  %899 = vmatpush.bf16.msrb.mxu0 %v1917_v41 }
 0x10e   :  { %912 = vmatpush.bf16.msrb.mxu1 %v1907_v10  ;;  %900 = vmatpush.bf16.msrb.mxu0 %v1927_v60 }
 0x112   :  { %913 = vmatpush.bf16.msrb.mxu1 %v1919_v43  ;;  %901 = vmatpush.bf16.msrb.mxu0 %v1936_v62 }
 0x116   :  { %914 = vmatpush.bf16.msrb.mxu1 %v1929_v13 }
 0x11a   :  { %915 = vmatpush.bf16.msrb.mxu1 %v1938_v14 }
 0x132   :  { %v576_v7 = vpop.f32.mrf.mxu0 }
 0x133   :  { %v613_v57 = vadd.f32 %v612_v21, %v576_v7 }
 0x13a   :  { %v590_v8 = vpop.f32.mrf.mxu1  ;;  %v578_v17 = vpop.f32.mrf.mxu0 }
 0x13b   :  { %v627_v58 = vadd.f32 %v626_v34, %v590_v8  ;;  %v615_v54 = vadd.f32 %v614_v53, %v578_v17 }
 0x142   :  { %v592_v33 = vpop.f32.mrf.mxu1 }
 0x143   :  { %v629_v24 = vadd.f32 %v628_v31, %v592_v33 }
 0x152   :  { %v652_v45 = vpop.f32.mrf.mxu0 }
 0x153   :  { %v2028_v6 = vadd.f32 %v652_v45, %v613_v57 }
 0x155   :  { %v680_v1 = vmul.f32 %v676_v9, %v2028_v6 }
 0x157   :  { %v690_v43 = vmul.f32 %v680_v1, %v2028_v6 }
 0x15a   :  { %v666_v30 = vpop.f32.mrf.mxu1  ;;  %v654_v32 = vpop.f32.mrf.mxu0 }
 0x15b   :  { %v2030_v52 = vadd.f32 %v666_v30, %v627_v58  ;;  %v2034_v35 = vadd.f32 %v654_v32, %v615_v54 }
 0x15d   :  { %v681_v2 = vmul.f32 %v677_v28, %v2030_v52  ;;  %v682_v60 = vmul.f32 %v676_v9, %v2034_v35 }
 0x15f   :  { %v684_v55 = vadd.f32 %v681_v2, %v680_v1  ;;  %v691_v41 = vmul.f32 %v681_v2, %v2030_v52  ;;  %v692_v25 = vmul.f32 %v682_v60, %v2034_v35 }
 0x161   :  { %685 = vadd.xlane.f32.xlu1 %v684_v55  ;;  %v694_v62 = vadd.f32 %v691_v41, %v690_v43  ;;  %v1695_v41 = vmov 0   ;;  %v2081_v43 = vld [vmem:[%s2172_s4] sm:$0xff] }
 0x162   :  { %v668_v0 = vpop.f32.mrf.mxu1  ;;  %1648 = vset.pattern.permute.xlu0 %v1695_v41  ;;  %1647 = vset.pattern.permute.xlu2 %v1695_v41 }
 0x163   :  { %v2036_v10 = vadd.f32 %v668_v0, %v629_v24 }
 0x165   :  { %v683_v13 = vmul.f32 %v677_v28, %v2036_v10 }
 0x167   :  { %v687_v14 = vadd.f32 %v683_v13, %v682_v60  ;;  %v693_v16 = vmul.f32 %v683_v13, %v2036_v10 }
 0x169   :  { %695 = vadd.xlane.f32.xlu1 %v694_v62  ;;  %688 = vadd.xlane.f32.xlu0 %v687_v14  ;;  %v697_v29 = vadd.f32 %v693_v16, %v692_v25  ;;  %v2088_v14 = vld [vmem:[%s2172_s4 + $0x8] sm:$0xff] }
 0x171   :  { %698 = vadd.xlane.f32.xlu0 %v697_v29 }
 0x1d4   :  { %v686_v38 = vpop.xlane.xlu1 %685 }
 0x1dc   :  { %v689_v44 = vpop.xlane.xlu0 %688  ;;  %v696_v56 = vpop.xlane.xlu1 %695 }
 0x1dd   :  { %v701_v61 = vsel %vm700_vm1, %v686_v38, %v696_v56  ;;  %v1696_v38 = vmov 1  }
 0x1de   :  { %1650 = vset.pattern.permute.xlu1 %v1696_v38 }
 0x1e4   :  { %v699_v5 = vpop.xlane.xlu0 %698 }
 0x1e5   :  { %v702_v23 = vsel %vm700_vm1, %v689_v44, %v699_v5 }
 0x1e6   :  { %723 = vmatpush.msrb.mxu2 %v702_v23 }
 0x1e8   :  { %724 = vmatpush.msrb.mxu2 %v701_v61 }
 0x1e9   :  { %1539 = vmatmul.msk.f32.vlgmr.msrb.gmra.mxu2 %vm563_vm0, %v2048_v47 }
 0x1ea   :  { %866 = vmatpush.bf16.msra.mxu2 %v2201_v20 }
 0x1ee   :  { %867 = vmatpush.bf16.msra.mxu2 %v2202_v27 }
 0x1f1   :  { %1540 = vmatmul.msk.f32.gmra.mxu2 %vm563_vm0, %v2057_v26 }
 0x1f2   :  { %868 = vmatpush.bf16.msra.mxu2 %v2203_v40 }
 0x1f6   :  { %869 = vmatpush.bf16.msra.mxu2 %v2204_v36 }
 0x1fa   :  { %870 = vmatpush.bf16.msra.mxu2 %v2205_v51 }
 0x1fe   :  { %871 = vmatpush.bf16.msra.mxu2 %v2206_v22 }
 0x202   :  { %872 = vmatpush.bf16.msra.mxu2 %v2207_v50 }
 0x206   :  { %873 = vmatpush.bf16.msra.mxu2 %v2208_v19 }
 0x20a   :  { %922 = vmatpush.bf16.msrb.mxu2 %v2209_v59 }
 0x20e   :  { %923 = vmatpush.bf16.msrb.mxu2 %v2210_v4 }
 0x212   :  { %924 = vmatpush.bf16.msrb.mxu2 %v2211_v18 }
 0x216   :  { %925 = vmatpush.bf16.msrb.mxu2 %v2212_v37 }
 0x21a   :  { %926 = vmatpush.bf16.msrb.mxu2 %v2213_v48 }
 0x21e   :  { %927 = vmatpush.bf16.msrb.mxu2 %v1922_v63 }
 0x222   :  { %928 = vmatpush.bf16.msrb.mxu2 %v1932_v39 }
 0x226   :  { %929 = vmatpush.bf16.msrb.mxu2 %v1941_v42 }
 0x26c   :  { %v726_v3 = vpop.f32.mrf.mxu2 }
 0x26d   :  { %v732_v7 = vmul.f32 0.0014880953, %v726_v3 }
 0x26f   :  { %v734_v8 = vmul.f32 %v732_v7, %v732_v7 }
 0x271   :  { %738 = vrot.lane.b32.xlu2 %v734_v8, %s1693_s22 }
 0x274   :  { %v729_v17 = vpop.f32.mrf.mxu2 }
 0x275   :  { %v733_v21 = vmul.f32 0.0014880953, %v729_v17 }
 0x277   :  { %v735_v33 = vmul.f32 %v733_v21, %v733_v21 }
 0x279   :  { %740 = vrot.lane.b32.xlu2 %v735_v33, %s1693_s22 }
 0x2cb   :  { %v739_v34 = vpop.permute.xlu2 %738 }
 0x2cc   :  { %v744_v45 = vsub.f32 %v732_v7, %v739_v34 }
 0x2ce   :  { %v746_v46 = vadd.f32 1e-05, %v744_v45 }
 0x2d0   :  { %1656 = vrsqrt.f32 %v746_v46  ;;  %vm754_vm3 = vweird.f32 %v746_v46 }
 0x2d3   :  { %v741_v63 = vpop.permute.xlu2 %740 }
 0x2d4   :  { %v745_v57 = vsub.f32 %v733_v21, %v741_v63 }
 0x2d6   :  { %v1657_v39 = vpop.eup %1656  ;;  %v747_v58 = vadd.f32 1e-05, %v745_v57 }
 0x2d7   :  { %v749_v42 = vmul.f32 %v1657_v39, %v746_v46  ;;  %vm755_vm2 = vweird.f32 %v1657_v39 }
 0x2d8   :  { %1658 = vrsqrt.f32 %v747_v58  ;;  %vm756_vm4 = vmor %vm754_vm3, %vm755_vm2  ;;  %vm764_vm6 = vweird.f32 %v747_v58 }
 0x2d9   :  { %v750_v9 = vmul.f32 %v1657_v39, %v749_v42 }
 0x2db   :  { %v751_v28 = vmul.f32 0.5, %v750_v9 }
 0x2dd   :  { %v752_v30 = vsub.f32 1.5, %v751_v28  ;;  %v1631_v28 = vld [vmem:[%s2170_s2 + $0x20] sm:$0xff] }
 0x2de   :  { %v1659_v53 = vpop.eup %1658 }
 0x2df   :  { %v759_v1 = vmul.f32 %v1659_v53, %v747_v58  ;;  %v753_v2 = vmul.f32 %v1657_v39, %v752_v30  ;;  %vm765_vm5 = vweird.f32 %v1659_v53 }
 0x2e0   :  { %vm766_vm7 = vmor %vm764_vm6, %vm765_vm5 }
 0x2e1   :  { %v760_v31 = vmul.f32 %v1659_v53, %v759_v1  ;;  %v757_v32 = vsel %vm756_vm4, %v1657_v39, %v753_v2 }
 0x2e2   :  { %770 = vrot.lane.b32.xlu0 %v757_v32, %s1694_s23 }
 0x2e3   :  { %v761_v54 = vmul.f32 0.5, %v760_v31 }
 0x2e5   :  { %v762_v55 = vsub.f32 1.5, %v761_v54 }
 0x2e7   :  { %v763_v24 = vmul.f32 %v1659_v53, %v762_v55 }
 0x2e9   :  { %v767_v0 = vsel %vm766_vm7, %v1659_v53, %v763_v24 }
 0x2ea   :  { %772 = vrot.lane.b32.xlu1 %v767_v0, %s1694_s23 }
 0x354   :  { %v771_v60 = vpop.permute.xlu0 %770 }
 0x355   :  { %v776_v13 = vmul.f32 %v771_v60, %v2081_v43 }
 0x357   :  { %v792_v62 = vmul.f32 %v776_v13, %v732_v7 }
 0x359   :  { %796 = vrot.lane.b32.xlu2 %v792_v62, %s1693_s22 }
 0x35c   :  { %v773_v16 = vpop.permute.xlu1 %772 }
 0x35d   :  { %v777_v25 = vmul.f32 %v773_v16, %v2088_v14  ;;  %v1632_v16 = vld [vmem:[%s2170_s2 + $0x28] sm:$0xff] }
 0x35f   :  { %v793_v29 = vmul.f32 %v777_v25, %v733_v21  ;;  %785 = vperm.xlu0 %1648, %v777_v25  }
 0x361   :  { %798 = vrot.lane.b32.xlu2 %v793_v29, %s1693_s22 }
 0x369   :  { %780 = vperm.xlu2 %1647, %v776_v13  }
 0x371   :  { %1649 = vset.pattern.permute.xlu2 %v1696_v38 }
 0x3b3   :  { %v797_v44 = vpop.permute.xlu2 %796 }
 0x3b4   :  { %v802_v56 = vsub.f32 %v2081_v43, %v797_v44 }
 0x3b6   :  { %806 = vperm.xlu2 %1649, %v802_v56  }
 0x3bb   :  { %v799_v5 = vpop.permute.xlu2 %798 }
 0x3bc   :  { %v803_v23 = vsub.f32 %v2088_v14, %v799_v5 }
 0x3be   :  { %811 = vperm.xlu1 %1650, %v803_v23  }
 0x3c3   :  { %v781_v61 = vpop.permute.xlu2 %780 }
 0x3c4   :  { %v788_v40 = vmul.f32 %v781_v61, %v2028_v6  ;;  %v789_v36 = vmul.f32 %v781_v61, %v2030_v52  ;;  %v1630_v6 = vld [vmem:[%s2170_s2 + $0x18] sm:$0xff]  ;;  %v1264_v61 = vld [vmem:[%s2173_s5 + $0x1] ss:$2 sm:$0x3]  ;;  %s1698_s2 = smov 126   ;;  %s1699_s5 = smov 3  }
 0x3d1   :  { %v786_v20 = vpop.permute.xlu0 %785 }
 0x3d2   :  { %v790_v51 = vmul.f32 %v786_v20, %v2034_v35  ;;  %v791_v22 = vmul.f32 %v786_v20, %v2036_v10 }
 0x410   :  { %v807_v27 = vpop.permute.xlu2 %806 }
 0x411   :  { %v814_v50 = vadd.f32 %v807_v27, %v788_v40  ;;  %v815_v19 = vadd.f32 %v807_v27, %v789_v36  ;;  %v1059_v36 = vperm.slane %v1264_v61, 0 }
 0x413   :  { %v818_v37 = vmax.f32 %v814_v50, 0.0  ;;  %v819_v48 = vmax.f32 %v815_v19, 0.0 }
 0x430   :  { %v812_v59 = vpop.permute.xlu1 %811 }
 0x431   :  { %v816_v4 = vadd.f32 %v812_v59, %v790_v51  ;;  %v817_v18 = vadd.f32 %v812_v59, %v791_v22  ;;  %v1060_v51 = vperm.slane %v1264_v61, 1 }
 0x433   :  { %v820_v3 = vmax.f32 %v816_v4, 0.0  ;;  %v821_v7 = vmax.f32 %v817_v18, 0.0 }
 0x435   :  { %v822_v8 = vpack.c.bf16 %v820_v3, %v818_v37  ;;  %v823_v17 = vpack.c.bf16 %v821_v7, %v819_v48 }
 0x437   :  { %832 = vmatmul.bf16.vlgmr.msrb.gmra.mxu3 %v822_v8  ;;  %846 = vmatmul.bf16.vlgmr.msra.gmra.mxu0 %v823_v17 }
 0x438   :  { %860 = vmatmul.bf16.vlgmr.msra.gmra.mxu1 %v822_v8  ;;  %874 = vmatmul.bf16.vlgmr.msra.gmra.mxu2 %v823_v17 }
 0x439   :  { %993 = vmatpush.bf16.msra.mxu1 %v822_v8  ;;  %1007 = vmatpush.bf16.msra.mxu2 %v823_v17 }
 0x447   :  { %888 = vmatmul.bf16.vlgmr.msra.gmra.mxu3 %v822_v8  ;;  %902 = vmatmul.bf16.vlgmr.msrb.gmra.mxu0 %v823_v17 }
 0x448   :  { %916 = vmatmul.bf16.vlgmr.msrb.gmra.mxu1 %v822_v8  ;;  %930 = vmatmul.bf16.vlgmr.msrb.gmra.mxu2 %v823_v17 }
 0x458   :  { %1552 = vmatmul.msk.bf16.vlgmr.msra.gmra.mxu2 %vm563_vm0, %v1630_v6  ;;  %1551 = vmatmul.msk.bf16.vlgmr.msra.gmra.mxu1 %vm563_vm0, %v1630_v6 }
 0x4b4   :  { %v847_v52 = vpop.f32.mrf.mxu0 }
 0x4b5   :  { %v861_v35 = vpop.f32.mrf.mxu1 }
 0x4ba   :  { %v833_v10 = vpop.f32.mrf.mxu3 }
 0x4bb   :  { %v875_v21 = vpop.f32.mrf.mxu2  ;;  %v848_v46 = vadd.f32 %v847_v52, %v833_v10 }
 0x4bc   :  { %v849_v33 = vpop.f32.mrf.mxu0  ;;  %v876_v39 = vadd.f32 %v875_v21, %v861_v35 }
 0x4bd   :  { %v863_v34 = vpop.f32.mrf.mxu1 }
 0x4c2   :  { %v835_v45 = vpop.f32.mrf.mxu3 }
 0x4c3   :  { %v850_v63 = vadd.f32 %v849_v33, %v835_v45  ;;  %v877_v57 = vpop.f32.mrf.mxu2 }
 0x4c4   :  { %v878_v58 = vadd.f32 %v877_v57, %v863_v34  ;;  %v903_v30 = vpop.f32.mrf.mxu0 }
 0x4c5   :  { %v940_v42 = vpack.c.bf16 %v850_v63, %v848_v46  ;;  %v917_v53 = vpop.f32.mrf.mxu1 }
 0x4c6   :  { %v941_v9 = vpack.c.bf16 %v878_v58, %v876_v39 }
 0x4c7   :  { %957 = vmatpush.bf16.msrb.mxu3 %v940_v42 }
 0x4c8   :  { %971 = vmatpush.bf16.msra.mxu0 %v941_v9 }
 0x4ca   :  { %v889_v1 = vpop.f32.mrf.mxu3  ;;  %1545 = vmatmul.msk.bf16.vlgmr.msrb.gmra.mxu3 %vm563_vm0, %v1631_v28 }
 0x4cb   :  { %v931_v2 = vpop.f32.mrf.mxu2  ;;  %1546 = vmatmul.msk.bf16.vlgmr.msra.gmra.mxu0 %vm563_vm0, %v1631_v28  ;;  %v904_v54 = vadd.f32 %v903_v30, %v889_v1 }
 0x4cc   :  { %v905_v31 = vpop.f32.mrf.mxu0  ;;  %v932_v41 = vadd.f32 %v931_v2, %v917_v53 }
 0x4cd   :  { %v919_v55 = vpop.f32.mrf.mxu1 }
 0x4d2   :  { %v891_v32 = vpop.f32.mrf.mxu3 }
 0x4d3   :  { %v906_v24 = vadd.f32 %v905_v31, %v891_v32  ;;  %v933_v0 = vpop.f32.mrf.mxu2 }
 0x4d4   :  { %v934_v60 = vadd.f32 %v933_v0, %v919_v55 }
 0x4d5   :  { %v1016_v13 = vpack.c.bf16 %v906_v24, %v904_v54  ;;  %v995_v5 = vpop.f32.mrf.mxu1 }
 0x4d6   :  { %v1017_v62 = vpack.c.bf16 %v934_v60, %v932_v41 }
 0x4d7   :  { %1033 = vmatpush.bf16.msra.mxu3 %v1016_v13 }
 0x4d8   :  { %1047 = vmatpush.bf16.msrb.mxu0 %v1017_v62 }
 0x4da   :  { %1557 = vmatmul.msk.bf16.vlgmr.msra.gmra.mxu3 %vm563_vm0, %v1632_v16 }
 0x4db   :  { %1558 = vmatmul.msk.bf16.vlgmr.msrb.gmra.mxu0 %vm563_vm0, %v1632_v16  ;;  %v1009_v44 = vpop.f32.mrf.mxu2 }
 0x4dd   :  { %v997_v48 = vpop.f32.mrf.mxu1 }
 0x4e3   :  { %v1011_v22 = vpop.f32.mrf.mxu2 }
 0x548   :  { %v973_v25 = vpop.f32.mrf.mxu0 }
 0x549   :  { %v1010_v20 = vadd.f32 %v1009_v44, %v973_v25 }
 0x54d   :  { %v959_v29 = vpop.f32.mrf.mxu3 }
 0x54e   :  { %v996_v27 = vadd.f32 %v995_v5, %v959_v29 }
 0x550   :  { %v975_v38 = vpop.f32.mrf.mxu0 }
 0x551   :  { %v1012_v59 = vadd.f32 %v1011_v22, %v975_v38 }
 0x555   :  { %v961_v56 = vpop.f32.mrf.mxu3 }
 0x556   :  { %v998_v8 = vadd.f32 %v997_v48, %v961_v56  ;;  %v1700_v48 = vmov 3  }
 0x557   :  { %1653 = vset.pattern.permute.xlu1 %v1700_v48 }
 0x558   :  { %v1049_v23 = vpop.f32.mrf.mxu0 }
 0x559   :  { %v2116_v40 = vadd.f32 %v1049_v23, %v1010_v20 }
 0x55b   :  { %v1064_v37 = vmul.f32 %v1060_v51, %v2116_v40 }
 0x55d   :  { %v1035_v50 = vpop.f32.mrf.mxu3  ;;  %v1074_v46 = vmul.f32 %v1064_v37, %v2116_v40 }
 0x55e   :  { %v2118_v19 = vadd.f32 %v1035_v50, %v996_v27  ;;  %v1697_v27 = vmov 2  }
 0x55f   :  { %1651 = vset.pattern.permute.xlu2 %v1697_v27  ;;  %1652 = vset.pattern.permute.xlu0 %v1697_v27 }
 0x560   :  { %v1051_v4 = vpop.f32.mrf.mxu0  ;;  %v1063_v18 = vmul.f32 %v1059_v36, %v2118_v19 }
 0x561   :  { %v2122_v3 = vadd.f32 %v1051_v4, %v1012_v59 }
 0x562   :  { %v1067_v7 = vadd.f32 %v1064_v37, %v1063_v18  ;;  %v1073_v45 = vmul.f32 %v1063_v18, %v2118_v19 }
 0x563   :  { %v1066_v52 = vmul.f32 %v1060_v51, %v2122_v3 }
 0x564   :  { %1068 = vadd.xlane.f32.xlu0 %v1067_v7  ;;  %v1077_v63 = vadd.f32 %v1074_v46, %v1073_v45 }
 0x565   :  { %v1037_v17 = vpop.f32.mrf.mxu3  ;;  %v1076_v33 = vmul.f32 %v1066_v52, %v2122_v3 }
 0x566   :  { %v2124_v6 = vadd.f32 %v1037_v17, %v998_v8 }
 0x568   :  { %v1065_v35 = vmul.f32 %v1059_v36, %v2124_v6 }
 0x56a   :  { %v1070_v10 = vadd.f32 %v1066_v52, %v1065_v35  ;;  %v1075_v21 = vmul.f32 %v1065_v35, %v2124_v6  ;;  %v114_v35 = vld [vmem:[%s2172_s4] sm:$0x1] }
 0x56c   :  { %1071 = vadd.xlane.f32.xlu2 %v1070_v10  ;;  %v1080_v34 = vadd.f32 %v1076_v33, %v1075_v21 }
 0x56e   :  { %1081 = vadd.xlane.f32.xlu1 %v1080_v34 }
 0x574   :  { %1078 = vadd.xlane.f32.xlu2 %v1077_v63 }
 0x5d7   :  { %v1069_v42 = vpop.xlane.xlu0 %1068 }
 0x5df   :  { %v1072_v57 = vpop.xlane.xlu2 %1071 }
 0x5e1   :  { %v1082_v39 = vpop.xlane.xlu1 %1081 }
 0x5e2   :  { %v1084_v58 = vsel %vm700_vm1, %v1072_v57, %v1082_v39 }
 0x5e3   :  { %1099 = vmatpush.msrb.mxu1 %v1084_v58 }
 0x5e7   :  { %v1079_v9 = vpop.xlane.xlu2 %1078 }
 0x5e8   :  { %v1083_v28 = vsel %vm700_vm1, %v1069_v42, %v1079_v9 }
 0x5e9   :  { %1100 = vmatpush.msrb.mxu1 %v1083_v28 }
 0x5ea   :  { %1559 = vmatmul.msk.f32.vlgmr.msrb.gmra.mxu1 %vm563_vm0, %v2048_v47 }
 0x5f2   :  { %1560 = vmatmul.msk.f32.gmra.mxu1 %vm563_vm0, %v2057_v26 }
 0x667   :  { %v1102_v30 = vpop.f32.mrf.mxu1 }
 0x668   :  { %v1108_v53 = vmul.f32 0.0017361111, %v1102_v30 }
 0x66a   :  { %v1110_v1 = vmul.f32 %v1108_v53, %v1108_v53 }
 0x66c   :  { %1114 = vrot.lane.b32.xlu0 %v1110_v1, %s1693_s22 }
 0x66f   :  { %v1105_v2 = vpop.f32.mrf.mxu1 }
 0x670   :  { %v1109_v31 = vmul.f32 0.0017361111, %v1105_v2 }
 0x672   :  { %v1111_v32 = vmul.f32 %v1109_v31, %v1109_v31 }
 0x674   :  { %1116 = vrot.lane.b32.xlu1 %v1111_v32, %s1693_s22 }
 0x6de   :  { %v1115_v54 = vpop.permute.xlu0 %1114 }
 0x6df   :  { %v1120_v55 = vsub.f32 %v1108_v53, %v1115_v54 }
 0x6e1   :  { %v1122_v24 = vadd.f32 1e-05, %v1120_v55 }
 0x6e3   :  { %1660 = vrsqrt.f32 %v1122_v24  ;;  %vm1130_vm9 = vweird.f32 %v1122_v24 }
 0x6e6   :  { %v1117_v0 = vpop.permute.xlu1 %1116 }
 0x6e7   :  { %v1121_v41 = vsub.f32 %v1109_v31, %v1117_v0 }
 0x6e9   :  { %v1661_v47 = vpop.eup %1660  ;;  %v1123_v60 = vadd.f32 1e-05, %v1121_v41 }
 0x6ea   :  { %v1125_v13 = vmul.f32 %v1661_v47, %v1122_v24  ;;  %vm1131_vm8 = vweird.f32 %v1661_v47 }
 0x6eb   :  { %1662 = vrsqrt.f32 %v1123_v60  ;;  %vm1132_vm10 = vmor %vm1130_vm9, %vm1131_vm8  ;;  %vm1140_vm12 = vweird.f32 %v1123_v60 }
 0x6ec   :  { %v1126_v26 = vmul.f32 %v1661_v47, %v1125_v13 }
 0x6ee   :  { %v1127_v62 = vmul.f32 0.5, %v1126_v26 }
 0x6f0   :  { %v1128_v16 = vsub.f32 1.5, %v1127_v62 }
 0x6f1   :  { %v1663_v25 = vpop.eup %1662 }
 0x6f2   :  { %v1135_v29 = vmul.f32 %v1663_v25, %v1123_v60  ;;  %v1129_v38 = vmul.f32 %v1661_v47, %v1128_v16  ;;  %vm1141_vm11 = vweird.f32 %v1663_v25 }
 0x6f3   :  { %vm1142_vm13 = vmor %vm1140_vm12, %vm1141_vm11 }
 0x6f4   :  { %v1136_v44 = vmul.f32 %v1663_v25, %v1135_v29  ;;  %v1133_v56 = vsel %vm1132_vm10, %v1661_v47, %v1129_v38 }
 0x6f5   :  { %1146 = vrot.lane.b32.xlu0 %v1133_v56, %s1693_s22 }
 0x6f6   :  { %v1137_v5 = vmul.f32 0.5, %v1136_v44 }
 0x6f8   :  { %v1138_v23 = vsub.f32 1.5, %v1137_v5 }
 0x6fa   :  { %v1139_v61 = vmul.f32 %v1663_v25, %v1138_v23 }
 0x6fc   :  { %v1143_v20 = vsel %vm1142_vm13, %v1663_v25, %v1139_v61 }
 0x6fd   :  { %1148 = vrot.lane.b32.xlu2 %v1143_v20, %s1693_s22 }
 0x757   :  { %v1149_v36 = vpop.permute.xlu2 %1148 }
 0x758   :  { %v1153_v51 = vmul.f32 %v1149_v36, %v2088_v14 }
 0x75a   :  { %1170 = vrot.lane.b32.xlu1 %v1153_v51, %s1698_s2 }
 0x767   :  { %v1147_v22 = vpop.permute.xlu0 %1146 }
 0x768   :  { %v1152_v50 = vmul.f32 %v1147_v22, %v2081_v43 }
 0x76a   :  { %1168 = vrot.lane.b32.xlu2 %v1152_v50, %s1698_s2 }
 0x772   :  { %1161 = vperm.xlu2 %1651, %v1153_v51  }
 0x77a   :  { %1654 = vset.pattern.permute.xlu2 %v1700_v48 }
 0x7c4   :  { %v1169_v59 = vpop.permute.xlu2 %1168 }
 0x7c5   :  { %v1174_v4 = vmul.f32 %v1169_v59, %v1108_v53 }
 0x7c7   :  { %1178 = vrot.lane.b32.xlu1 %v1174_v4, %s1699_s5 }
 0x7cc   :  { %v1171_v18 = vpop.permute.xlu1 %1170  ;;  %v1162_v10 = vpop.permute.xlu2 %1161 }
 0x7cd   :  { %v1175_v37 = vmul.f32 %v1171_v18, %v1109_v31  ;;  %v1167_v46 = vmul.f32 %v1162_v10, %v2122_v3  ;;  %v111_v3 = vld [vmem:[%s2171_s3 + $0x10] sm:$0xff] }
 0x7cf   :  { %1180 = vrot.lane.b32.xlu0 %v1175_v37, %s1699_s5 }
 0x7d7   :  { %1156 = vperm.xlu0 %1652, %v1152_v50  }
 0x7df   :  { %1655 = vset.pattern.permute.xlu0 %v1700_v48 }
 0x839   :  { %v1179_v7 = vpop.permute.xlu1 %1178 }
 0x83a   :  { %v1184_v8 = vsub.f32 %v2081_v43, %v1179_v7  ;;  %v1166_v43 = vmul.f32 %v1162_v10, %v2124_v6 }
 0x83c   :  { %1188 = vperm.xlu2 %1654, %v1184_v8  }
 0x841   :  { %v1181_v17 = vpop.permute.xlu0 %1180 }
 0x842   :  { %v1185_v52 = vsub.f32 %v2088_v14, %v1181_v17 }
 0x844   :  { %1193 = vperm.xlu1 %1653, %v1185_v52  }
 0x849   :  { %v1157_v21 = vpop.permute.xlu0 %1156 }
 0x84a   :  { %v1164_v34 = vmul.f32 %v1157_v21, %v2118_v19  ;;  %v1165_v45 = vmul.f32 %v1157_v21, %v2116_v40 }
 0x84c   :  { %1209 = vrot.lane.b32.xlu1 %v114_v35, %s1701_s12 }
 0x896   :  { %v1189_v33 = vpop.permute.xlu2 %1188 }
 0x897   :  { %v1196_v63 = vadd.f32 %v1189_v33, %v1164_v34  ;;  %v1197_v14 = vadd.f32 %v1189_v33, %v1165_v45 }
 0x899   :  { %v1200_v42 = vadd.f32 %v1196_v63, %v1976_v11  ;;  %v1201_v9 = vadd.f32 %v1197_v14, %v1986_v49 }
 0x89b   :  { %v1204_v40 = vmax.f32 %v1200_v42, 0.0  ;;  %v1205_v1 = vmax.f32 %v1201_v9, 0.0 }
 0x8b6   :  { %v1194_v57 = vpop.permute.xlu1 %1193 }
 0x8b7   :  { %v1198_v39 = vadd.f32 %v1194_v57, %v1166_v43  ;;  %v1199_v58 = vadd.f32 %v1194_v57, %v1167_v46 }
 0x8b9   :  { %v1202_v28 = vadd.f32 %v1198_v39, %v1978_v15  ;;  %v1203_v30 = vadd.f32 %v1199_v58, %v1988_v12 }
 0x8bb   :  { %v1206_v19 = vmax.f32 %v1202_v28, 0.0  ;;  %v1207_v53 = vmax.f32 %v1203_v30, 0.0 }
 0x8bd   :  { %1231 = vmatpush.msrb.mxu2 %v1206_v19  ;;  %1251 = vmatpush.msrb.mxu3 %v1207_v53 }
 0x8be   :  { %v1210_v11 = vpop.permute.xlu1 %1209 }
 0x8bf   :  { %1232 = vmatpush.msrb.mxu2 %v1204_v40  ;;  %1252 = vmatpush.msrb.mxu3 %v1205_v1  ;;  %1633 = vpush %v1210_v11 }
 0x8c0   :  { %1561 = vmatmul.msk.f32.vlgmr.msrb.gmra.mxu2 %vm563_vm0, %v111_v3  ;;  %1562 = vmatmul.msk.f32.vlgmr.msrb.gmra.mxu3 %vm563_vm0, %v111_v3 }
 0x8f0   :  { %s1634_s14 = spop %1633 }
 0x8f1   :  { %v1212_v15 = vstv %s1634_s14 }
 0x943   :  { %v1234_v49 = vpop.f32.mrf.mxu2  ;;  %v1254_v12 = vpop.f32.mrf.mxu3 }
 0x944   :  { %v1235_v6 = vadd.f32 %v1234_v49, %v1212_v15  ;;  %v1255_v2 = vadd.f32 %v1254_v12, %v1212_v15 }
 0x946   :  { %1257 = vst [vmem:[%s2174_s6] sm:$0xff] %v1235_v6 }
 0x947   :  { %1258 = vst [vmem:[%s2174_s6 + $0x8] sm:$0xff] %v1255_v2 }
 0x948   :  { %1263 = vsyncpa [#allocation3], 1 }

</bundles_post_ra>
